<compile_context>
chip_gen: v7x
topology: tpu7x:2x2x1
jax: 0.10.0
libtpu: 0.0.40
codegen_flags: <defaults>
</compile_context>

<pallas_src>
import functools

import jax
import jax.numpy as jnp
from jax import lax
from jax.experimental import pallas as pl
from jax.experimental.pallas import tpu as pltpu

HIGHEST = lax.Precision.HIGHEST  # reference only


def _bottleneck_kernel(x_ref, w1_ref, w2_ref, w3_ref,
                       b1_ref, b2_ref, b3_ref,
                       *rest,
                       H, W, Cin, Cmid, Cout, stride, has_downsample):
    if has_downsample:
        wd_ref, bd_ref, o_ref, win_ref = rest
    else:
        o_ref, win_ref = rest

    Ho = (H - 1) // stride + 1
    Wo = (W - 1) // stride + 1
    HW = H * W
    K2 = 3 * Cmid
    bf16 = jnp.bfloat16

    # ---- conv1 (1x1, BN scale folded into w1) + bias + relu ----------------
    x2d = x_ref[...]                                          # (H*W, Cin) bf16
    h1 = jnp.dot(x2d, w1_ref[...], preferred_element_type=jnp.float32)
    h1 = jnp.maximum(h1 + b1_ref[...], 0.0)                   # (HW, Cmid) f32

    # ---- build the conv2 [x[:,j-1] | x[:,j] | x[:,j+1]] window ONCE --------
    # (HW, 1) column-index mask, computed once per image (not per dy tap).
    col = lax.broadcasted_iota(jnp.int32, (HW, 1), 0) % W
    left = jnp.where(col == 0, 0.0, pltpu.roll(h1, shift=1, axis=0))
    right = jnp.where(col == W - 1, 0.0, pltpu.roll(h1, shift=HW - 1, axis=0))
    win = jnp.concatenate([left, h1, right], axis=1).astype(bf16)  # (HW, 3*Cmid)

    # ---- conv2 (3x3, stride, pad=1) + bias + relu --------------------------
    # Scratch is padded along H only; halo rows are zeroed every step (cheap,
    # and correct when the batch grid is sharded across TensorCores).
    acc = jnp.zeros((Ho * Wo, Cmid), jnp.float32)
    if stride == 1:
        # Flat ((H+2)*W, 3*Cmid) bf16 scratch: all offsets below are static,
        # so each dy band is a plain shifted load (no retiling copies).
        win_ref[pl.ds(0, W), :] = jnp.zeros((W, K2), bf16)
        win_ref[pl.ds((H + 1) * W, W), :] = jnp.zeros((W, K2), bf16)
        win_ref[pl.ds(W, HW), :] = win
        for dy in range(3):
            band = win_ref[pl.ds(dy * W, HW), :]              # (HW, 3*Cmid) bf16
            acc = acc + jnp.dot(band, w2_ref[dy],
                                preferred_element_type=jnp.float32)
    else:
        # 3-D padded scratch; gather the strided columns BEFORE the dot so a
        # stride-s block does 1/s^2 of the conv2 MXU work.
        win_ref[0:1, :, :] = jnp.zeros((1, W, K2), bf16)
        win_ref[H + 1:H + 2, :, :] = jnp.zeros((1, W, K2), bf16)
        win_ref[1:H + 1, :, :] = win.reshape(H, W, K2)
        for dy in range(3):
            band3 = win_ref[pl.ds(dy, Ho, stride), :, :]      # (Ho, W, 3*Cmid)
            band = band3[:, ::stride, :].reshape(Ho * Wo, K2)
            acc = acc + jnp.dot(band, w2_ref[dy],
                                preferred_element_type=jnp.float32)

    h2 = jnp.maximum(acc + b2_ref[...], 0.0).astype(bf16)     # (Ho*Wo, Cmid)

    # ---- conv3 (1x1, BN scale folded into w3) + bias -----------------------
    h3 = jnp.dot(h2, w3_ref[...], preferred_element_type=jnp.float32)
    h3 = h3 + b3_ref[...]                                     # (Ho*Wo, Cout) f32

    # ---- identity / downsample path ----------------------------------------
    # NOTE: identity is carried through bf16 x (deliberate precision deviation
    # from the f32 PyTorch reference; covered by the test tolerance).
    if has_downsample:
        if stride == 1:
            xs = x2d
        else:
            xs = x2d.reshape(H, W, Cin)[::stride, ::stride, :].reshape(
                Ho * Wo, Cin)
        ident = jnp.dot(xs, wd_ref[...], preferred_element_type=jnp.float32)
        ident = ident + bd_ref[...]
    else:
        ident = x2d.astype(jnp.float32)                       # Cin == Cout here

    o_ref[...] = jnp.maximum(h3 + ident, 0.0).astype(o_ref.dtype)


def _const_spec(shape):
    """Grid-invariant operand: constant index_map + single buffering."""
    nd = len(shape)
    index_map = lambda n, _nd=nd: (0,) * _nd
    try:
        # No point double-buffering a block whose index never changes.
        return pl.BlockSpec(shape, index_map, pipeline_mode=pl.Buffered(1))
    except (TypeError, AttributeError):
        return pl.BlockSpec(shape, index_map)


def bottleneck_forward_nhwc(x_nhwc, params, *, stride=1):
    """Runs the Bottleneck block on NHWC input. Returns bf16 NHWC output.

    For a chain of blocks, keep activations bf16 NHWC between calls: the
    kernel consumes and emits bf16, so no casts or transposes are inserted.
    """
    N, H, W, Cin = x_nhwc.shape
    Cmid = params["w1"].shape[1]
    Cout = params["w3"].shape[1]
    has_downsample = "wd" in params
    if stride != 1 or Cin != Cout:
        assert has_downsample, "stride!=1 or Cin!=Cout requires downsample params"
    Ho = (H - 1) // stride + 1
    Wo = (W - 1) // stride + 1
    bf16 = jnp.bfloat16

    x_flat = x_nhwc.reshape(N, H * W, Cin)
    if x_flat.dtype != bf16:
        x_flat = x_flat.astype(bf16)

    # Fold the BN scales into the weights in f32, then cast once to bf16.
    w1 = (params["w1"] * params["s1"]).astype(bf16)                   # (Cin, Cmid)
    w2 = (params["w2"] * params["s2"].reshape(1, 1, 1, Cmid)).astype(bf16)
    w2 = w2.reshape(3, 3 * Cmid, Cmid)             # K index = kx*Cmid + ci
    w3 = (params["w3"] * params["s3"]).astype(bf16)                   # (Cmid, Cout)

    kernel = functools.partial(
        _bottleneck_kernel,
        H=H, W=W, Cin=Cin, Cmid=Cmid, Cout=Cout,
        stride=stride, has_downsample=has_downsample)

    in_specs = [
        pl.BlockSpec((None, H * W, Cin), lambda n: (n, 0, 0)),   # x (batch squeezed)
        _const_spec((Cin, Cmid)),                                # w1 (scale folded)
        _const_spec((3, 3 * Cmid, Cmid)),                        # w2 (merged-K)
        _const_spec((Cmid, Cout)),                               # w3
        _const_spec((1, Cmid)),                                  # b1
        _const_spec((1, Cmid)),                                  # b2
        _const_spec((1, Cout)),                                  # b3
    ]
    args = [x_flat, w1, w2, w3, params["b1"], params["b2"], params["b3"]]
    if has_downsample:
        wd = (params["wd"] * params["sd"]).astype(bf16)
        in_specs += [_const_spec((Cin, Cout)), _const_spec((1, Cout))]
        args += [wd, params["bd"]]

    if stride == 1:
        win_scratch = pltpu.VMEM(((H + 2) * W, 3 * Cmid), bf16)
    else:
        win_scratch = pltpu.VMEM((H + 2, W, 3 * Cmid), bf16)

    # VMEM residency estimate (bytes): double-buffered x/out blocks,
    # single-buffered weights, the window scratch, plus f32 in-kernel temps.
    resid = (2 * H * W * Cin * 2
             + 2 * Ho * Wo * Cout * 2
             + (Cin * Cmid + 9 * Cmid * Cmid + Cmid * Cout
                + (Cin * Cout if has_downsample else 0)) * 2
             + (H + 2) * W * 3 * Cmid * 2
             + H * W * (4 * Cmid + Cin + Cout) * 4)
    vmem_limit = int(min(40 << 20, max(8 << 20, 2 * resid)))

    out_flat = pl.pallas_call(
        kernel,
        out_shape=jax.ShapeDtypeStruct((N, Ho * Wo, Cout), bf16),
        grid=(N,),
        in_specs=in_specs,
        out_specs=pl.BlockSpec((None, Ho * Wo, Cout), lambda n: (n, 0, 0)),
        scratch_shapes=[win_scratch],
        compiler_params=pltpu.CompilerParams(
            dimension_semantics=("parallel",),
            vmem_limit_bytes=vmem_limit),
    )(*args)

    return out_flat.reshape(N, Ho, Wo, Cout)


def bottleneck_forward(x_nchw, params, *, stride=1):
    """NCHW wrapper for parity with the PyTorch module (returns bf16 NCHW).

    For a chain of blocks, call bottleneck_forward_nhwc directly and keep
    activations in bf16 NHWC to avoid an extra HBM transpose per block.
    """
    x = jnp.transpose(x_nchw, (0, 2, 3, 1))        # NCHW -> NHWC
    out = bottleneck_forward_nhwc(x, params, stride=stride)
    return jnp.transpose(out, (0, 3, 1, 2))        # NHWC -> NCHW


# --------------------------- parameter setup -----------------------------

def fold_bn(gamma, beta, mean, var, eps=1e-5):
    scale = gamma / jnp.sqrt(var + eps)
    bias = beta - mean * scale
    return (scale.reshape(1, -1).astype(jnp.float32),
            bias.reshape(1, -1).astype(jnp.float32))


def init_params(key, in_channels, mid_channels, out_channels, stride=1):
    ks = jax.random.split(key, 12)
    p = {}
    p["w1"] = 0.1 * jax.random.normal(ks[0], (in_channels, mid_channels), jnp.float32)
    p["w2"] = 0.1 * jax.random.normal(ks[1], (3, 3, mid_channels, mid_channels), jnp.float32)
    p["w3"] = 0.1 * jax.random.normal(ks[2], (mid_channels, out_channels), jnp.float32)

    def bn(key, c):
        k1, k2, k3, k4 = jax.random.split(key, 4)
        gamma = 1.0 + 0.1 * jax.random.normal(k1, (c,), jnp.float32)
        beta = 0.1 * jax.random.normal(k2, (c,), jnp.float32)
        mean = 0.1 * jax.random.normal(k3, (c,), jnp.float32)
        var = jax.random.uniform(k4, (c,), jnp.float32, 0.5, 1.5)
        return gamma, beta, mean, var

    p["s1"], p["b1"] = fold_bn(*bn(ks[3], mid_channels))
    p["s2"], p["b2"] = fold_bn(*bn(ks[4], mid_channels))
    p["s3"], p["b3"] = fold_bn(*bn(ks[5], out_channels))

    if stride != 1 or in_channels != out_channels:
        p["wd"] = 0.1 * jax.random.normal(ks[6], (in_channels, out_channels), jnp.float32)
        p["sd"], p["bd"] = fold_bn(*bn(ks[7], out_channels))
    return p


# ------------------------ pure-JAX reference -----------------------------

def reference_forward(x_nchw, params, *, stride=1):
    x = jnp.transpose(x_nchw, (0, 2, 3, 1))   # NHWC
    dn = ("NHWC", "HWIO", "NHWC")

    def conv(h, w_hwio, s, pad):
        return lax.conv_general_dilated(h, w_hwio, (s, s), pad,
                                        dimension_numbers=dn, precision=HIGHEST)

    Cin, Cmid = params["w1"].shape
    Cout = params["w3"].shape[1]
    h = conv(x, params["w1"].reshape(1, 1, Cin, Cmid), 1, "VALID")
    h = jnp.maximum(h * params["s1"][0] + params["b1"][0], 0.0)
    h = conv(h, params["w2"], stride, [(1, 1), (1, 1)])
    h = jnp.maximum(h * params["s2"][0] + params["b2"][0], 0.0)
    h = conv(h, params["w3"].reshape(1, 1, Cmid, Cout), 1, "VALID")
    h = h * params["s3"][0] + params["b3"][0]
    if "wd" in params:
        ident = conv(x, params["wd"].reshape(1, 1, Cin, Cout), stride, "VALID")
        ident = ident * params["sd"][0] + params["bd"][0]
    else:
        ident = x
    out = jnp.maximum(h + ident, 0.0)
    return jnp.transpose(out, (0, 3, 1, 2))


if __name__ == "__main__":
    N, Cin, H, W = 2, 4, 16, 16
    Cmid, Cout = 4, 8
    stride = 1   # Cin != Cout -> downsample path exercised

    key = jax.random.PRNGKey(0)
    kx, kp = jax.random.split(key)
    x = jax.random.normal(kx, (N, Cin, H, W), jnp.float32)
    params = init_params(kp, Cin, Cmid, Cout, stride)

    out = bottleneck_forward(x, params, stride=stride)
    out = jax.block_until_ready(out)
    out_f32 = out.astype(jnp.float32)

    ref = reference_forward(x, params, stride=stride)
    assert out.shape == ref.shape, (out.shape, ref.shape)
    max_err = float(jnp.max(jnp.abs(out_f32 - ref)))
    # bf16 MXU path + bf16 output vs f32 HIGHEST reference -> loosened tolerance.
    assert jnp.allclose(out_f32, ref, atol=5e-2, rtol=5e-2), max_err

    print("KERNEL_OK")
</pallas_src>

<mosaic_0001>
module attributes {stable_mosaic.version = 11 : i64} {
  func.func @_bottleneck_kernel(%arg0: i32, %arg1: memref<1x256x4xbf16, #tpu.memory_space<vmem>>, %arg2: memref<4x4xbf16, #tpu.memory_space<vmem>>, %arg3: memref<3x12x4xbf16, #tpu.memory_space<vmem>>, %arg4: memref<4x8xbf16, #tpu.memory_space<vmem>>, %arg5: memref<1x4xf32, #tpu.memory_space<vmem>>, %arg6: memref<1x4xf32, #tpu.memory_space<vmem>>, %arg7: memref<1x8xf32, #tpu.memory_space<vmem>>, %arg8: memref<4x8xbf16, #tpu.memory_space<vmem>>, %arg9: memref<1x8xf32, #tpu.memory_space<vmem>>, %arg10: memref<1x256x8xbf16, #tpu.memory_space<vmem>>, %arg11: memref<288x12xbf16, #tpu.memory_space<vmem>>) attributes {dimension_semantics = [#tpu.dimension_semantics<parallel>], iteration_bounds = array<i64: 2>, scalar_prefetch = 0 : i64, scratch_operands = 1 : i64, tpu.core_type = #tpu.core_type<tc>, window_params = [{transform_indices = @transform_0, window_bounds = array<i64: 1, 256, 4>}, {pipeline_mode = #tpu.pipeline_mode<synchronous>, transform_indices = @transform_1, window_bounds = array<i64: 4, 4>}, {pipeline_mode = #tpu.pipeline_mode<synchronous>, transform_indices = @transform_2, window_bounds = array<i64: 3, 12, 4>}, {pipeline_mode = #tpu.pipeline_mode<synchronous>, transform_indices = @transform_3, window_bounds = array<i64: 4, 8>}, {pipeline_mode = #tpu.pipeline_mode<synchronous>, transform_indices = @transform_4, window_bounds = array<i64: 1, 4>}, {pipeline_mode = #tpu.pipeline_mode<synchronous>, transform_indices = @transform_5, window_bounds = array<i64: 1, 4>}, {pipeline_mode = #tpu.pipeline_mode<synchronous>, transform_indices = @transform_6, window_bounds = array<i64: 1, 8>}, {pipeline_mode = #tpu.pipeline_mode<synchronous>, transform_indices = @transform_7, window_bounds = array<i64: 4, 8>}, {pipeline_mode = #tpu.pipeline_mode<synchronous>, transform_indices = @transform_8, window_bounds = array<i64: 1, 8>}, {transform_indices = @transform_9, window_bounds = array<i64: 1, 256, 8>}]} {
    %c0 = arith.constant 0 : index
    %c0_0 = arith.constant 0 : index
    %c0_1 = arith.constant 0 : index
    %0 = vector.load %arg1[%c0, %c0_0, %c0_1] : memref<1x256x4xbf16, #tpu.memory_space<vmem>>, vector<1x256x4xbf16>
    %1 = vector.shape_cast %0 : vector<1x256x4xbf16> to vector<256x4xbf16>
    %c0_2 = arith.constant 0 : index
    %c0_3 = arith.constant 0 : index
    %2 = vector.load %arg2[%c0_2, %c0_3] : memref<4x4xbf16, #tpu.memory_space<vmem>>, vector<4x4xbf16>
    %cst = arith.constant dense<0.000000e+00> : vector<256x4xf32>
    %3 = tpu.matmul %1, %2, %cst {dimension_numbers = #tpu.dot_dimension_numbers<[1], [0], [0], [1], [0, 0, 1, 1], [], []>} : vector<256x4xbf16>, vector<4x4xbf16>, vector<256x4xf32> -> vector<256x4xf32>
    %c0_4 = arith.constant 0 : index
    %c0_5 = arith.constant 0 : index
    %4 = vector.load %arg5[%c0_4, %c0_5] : memref<1x4xf32, #tpu.memory_space<vmem>>, vector<1x4xf32>
    %5 = vector.broadcast %4 : vector<1x4xf32> to vector<256x4xf32>
    %6 = arith.addf %3, %5 : vector<256x4xf32>
    %cst_6 = arith.constant 0.000000e+00 : f32
    %7 = vector.broadcast %cst_6 : f32 to vector<256x4xf32>
    %8 = arith.maximumf %6, %7 : vector<256x4xf32>
    %9 = tpu.iota {dimensions = array<i32: 0>} : vector<256x1xi32>
    %c16_i32 = arith.constant 16 : i32
    %c0_i32 = arith.constant 0 : i32
    %10 = arith.cmpi eq, %c16_i32, %c0_i32 : i32
    %c1_i32 = arith.constant 1 : i32
    %11 = arith.select %10, %c1_i32, %c16_i32 : i32
    %12 = vector.broadcast %11 : i32 to vector<256x1xi32>
    %13 = arith.remsi %9, %12 : vector<256x1xi32>
    %c0_i32_7 = arith.constant 0 : i32
    %14 = vector.broadcast %c0_i32_7 : i32 to vector<256x1xi32>
    %15 = arith.cmpi ne, %13, %14 : vector<256x1xi32>
    %c0_i32_8 = arith.constant 0 : i32
    %16 = vector.broadcast %c0_i32_8 : i32 to vector<256x1xi32>
    %17 = arith.cmpi slt, %13, %16 : vector<256x1xi32>
    %c0_i32_9 = arith.constant 0 : i32
    %18 = arith.cmpi slt, %11, %c0_i32_9 : i32
    %19 = vector.broadcast %18 : i1 to vector<256x1xi1>
    %20 = vector.broadcast %19 : vector<256x1xi1> to vector<256x1xi1>
    %21 = arith.xori %17, %20 : vector<256x1xi1>
    %22 = arith.andi %21, %15 : vector<256x1xi1>
    %23 = vector.broadcast %11 : i32 to vector<256x1xi32>
    %24 = arith.addi %13, %23 : vector<256x1xi32>
    %25 = arith.select %22, %24, %13 : vector<256x1xi1>, vector<256x1xi32>
    %c0_i32_10 = arith.constant 0 : i32
    %26 = vector.broadcast %c0_i32_10 : i32 to vector<256x1xi32>
    %27 = arith.cmpi eq, %25, %26 : vector<256x1xi32>
    %c1_i32_11 = arith.constant 1 : i32
    %28 = tpu.dynamic_rotate %8 by %c1_i32_11 dim 0 : vector<256x4xf32>, i32 -> vector<256x4xf32>
    %cst_12 = arith.constant 0.000000e+00 : f32
    %29 = vector.shape_cast %27 : vector<256x1xi1> to vector<256x1xi1>
    %30 = vector.broadcast %29 : vector<256x1xi1> to vector<256x4xi1>
    %31 = vector.broadcast %cst_12 : f32 to vector<256x4xf32>
    %32 = arith.select %30, %31, %28 : vector<256x4xi1>, vector<256x4xf32>
    %c15_i32 = arith.constant 15 : i32
    %33 = vector.broadcast %c15_i32 : i32 to vector<256x1xi32>
    %34 = arith.cmpi eq, %25, %33 : vector<256x1xi32>
    %c255_i32 = arith.constant 255 : i32
    %35 = tpu.dynamic_rotate %8 by %c255_i32 dim 0 : vector<256x4xf32>, i32 -> vector<256x4xf32>
    %cst_13 = arith.constant 0.000000e+00 : f32
    %36 = vector.shape_cast %34 : vector<256x1xi1> to vector<256x1xi1>
    %37 = vector.broadcast %36 : vector<256x1xi1> to vector<256x4xi1>
    %38 = vector.broadcast %cst_13 : f32 to vector<256x4xf32>
    %39 = arith.select %37, %38, %35 : vector<256x4xi1>, vector<256x4xf32>
    %40 = tpu.concatenate %32, %8, %39 in 1 : vector<256x4xf32>, vector<256x4xf32>, vector<256x4xf32> -> vector<256x12xf32>
    %41 = arith.truncf %40 : vector<256x12xf32> to vector<256x12xbf16>
    %cst_14 = arith.constant 0.000000e+00 : f32
    %42 = vector.broadcast %cst_14 : f32 to vector<256x4xf32>
    %cst_15 = arith.constant 0.000000e+00 : bf16
    %43 = vector.broadcast %cst_15 : bf16 to vector<16x12xbf16>
    %c0_16 = arith.constant 0 : index
    %c0_17 = arith.constant 0 : index
    %44 = vector.load %arg11[%c0_16, %c0_17] : memref<288x12xbf16, #tpu.memory_space<vmem>>, vector<16x12xbf16>
    tpu.vector_store %arg11[%c0_16, %c0_17], %43 {strides = array<i32>} : memref<288x12xbf16, #tpu.memory_space<vmem>>, vector<16x12xbf16>,
    %cst_18 = arith.constant 0.000000e+00 : bf16
    %45 = vector.broadcast %cst_18 : bf16 to vector<16x12xbf16>
    %c272 = arith.constant 272 : index
    %c0_19 = arith.constant 0 : index
    %46 = vector.load %arg11[%c272, %c0_19] : memref<288x12xbf16, #tpu.memory_space<vmem>>, vector<16x12xbf16>
    tpu.vector_store %arg11[%c272, %c0_19], %45 {strides = array<i32>} : memref<288x12xbf16, #tpu.memory_space<vmem>>, vector<16x12xbf16>,
    %c16 = arith.constant 16 : index
    %c0_20 = arith.constant 0 : index
    %47 = vector.load %arg11[%c16, %c0_20] : memref<288x12xbf16, #tpu.memory_space<vmem>>, vector<256x12xbf16>
    tpu.vector_store %arg11[%c16, %c0_20], %41 {strides = array<i32>} : memref<288x12xbf16, #tpu.memory_space<vmem>>, vector<256x12xbf16>,
    %c0_21 = arith.constant 0 : index
    %c0_22 = arith.constant 0 : index
    %48 = vector.load %arg11[%c0_21, %c0_22] : memref<288x12xbf16, #tpu.memory_space<vmem>>, vector<256x12xbf16>
    %c0_23 = arith.constant 0 : index
    %c0_24 = arith.constant 0 : index
    %c0_25 = arith.constant 0 : index
    %49 = vector.load %arg3[%c0_23, %c0_24, %c0_25] : memref<3x12x4xbf16, #tpu.memory_space<vmem>>, vector<1x12x4xbf16>
    %50 = vector.shape_cast %49 : vector<1x12x4xbf16> to vector<12x4xbf16>
    %cst_26 = arith.constant dense<0.000000e+00> : vector<256x4xf32>
    %51 = tpu.matmul %48, %50, %cst_26 {dimension_numbers = #tpu.dot_dimension_numbers<[1], [0], [0], [1], [0, 0, 1, 1], [], []>} : vector<256x12xbf16>, vector<12x4xbf16>, vector<256x4xf32> -> vector<256x4xf32>
    %52 = arith.addf %42, %51 : vector<256x4xf32>
    %c16_27 = arith.constant 16 : index
    %c0_28 = arith.constant 0 : index
    %53 = vector.load %arg11[%c16_27, %c0_28] : memref<288x12xbf16, #tpu.memory_space<vmem>>, vector<256x12xbf16>
    %c1 = arith.constant 1 : index
    %c0_29 = arith.constant 0 : index
    %c0_30 = arith.constant 0 : index
    %54 = vector.load %arg3[%c1, %c0_29, %c0_30] : memref<3x12x4xbf16, #tpu.memory_space<vmem>>, vector<1x12x4xbf16>
    %55 = vector.shape_cast %54 : vector<1x12x4xbf16> to vector<12x4xbf16>
    %cst_31 = arith.constant dense<0.000000e+00> : vector<256x4xf32>
    %56 = tpu.matmul %53, %55, %cst_31 {dimension_numbers = #tpu.dot_dimension_numbers<[1], [0], [0], [1], [0, 0, 1, 1], [], []>} : vector<256x12xbf16>, vector<12x4xbf16>, vector<256x4xf32> -> vector<256x4xf32>
    %57 = arith.addf %52, %56 : vector<256x4xf32>
    %c32 = arith.constant 32 : index
    %c0_32 = arith.constant 0 : index
    %58 = vector.load %arg11[%c32, %c0_32] : memref<288x12xbf16, #tpu.memory_space<vmem>>, vector<256x12xbf16>
    %c2 = arith.constant 2 : index
    %c0_33 = arith.constant 0 : index
    %c0_34 = arith.constant 0 : index
    %59 = vector.load %arg3[%c2, %c0_33, %c0_34] : memref<3x12x4xbf16, #tpu.memory_space<vmem>>, vector<1x12x4xbf16>
    %60 = vector.shape_cast %59 : vector<1x12x4xbf16> to vector<12x4xbf16>
    %cst_35 = arith.constant dense<0.000000e+00> : vector<256x4xf32>
    %61 = tpu.matmul %58, %60, %cst_35 {dimension_numbers = #tpu.dot_dimension_numbers<[1], [0], [0], [1], [0, 0, 1, 1], [], []>} : vector<256x12xbf16>, vector<12x4xbf16>, vector<256x4xf32> -> vector<256x4xf32>
    %62 = arith.addf %57, %61 : vector<256x4xf32>
    %c0_36 = arith.constant 0 : index
    %c0_37 = arith.constant 0 : index
    %63 = vector.load %arg6[%c0_36, %c0_37] : memref<1x4xf32, #tpu.memory_space<vmem>>, vector<1x4xf32>
    %64 = vector.broadcast %63 : vector<1x4xf32> to vector<256x4xf32>
    %65 = arith.addf %62, %64 : vector<256x4xf32>
    %cst_38 = arith.constant 0.000000e+00 : f32
    %66 = vector.broadcast %cst_38 : f32 to vector<256x4xf32>
    %67 = arith.maximumf %65, %66 : vector<256x4xf32>
    %68 = arith.truncf %67 : vector<256x4xf32> to vector<256x4xbf16>
    %c0_39 = arith.constant 0 : index
    %c0_40 = arith.constant 0 : index
    %69 = vector.load %arg4[%c0_39, %c0_40] : memref<4x8xbf16, #tpu.memory_space<vmem>>, vector<4x8xbf16>
    %cst_41 = arith.constant dense<0.000000e+00> : vector<256x8xf32>
    %70 = tpu.matmul %68, %69, %cst_41 {dimension_numbers = #tpu.dot_dimension_numbers<[1], [0], [0], [1], [0, 0, 1, 1], [], []>} : vector<256x4xbf16>, vector<4x8xbf16>, vector<256x8xf32> -> vector<256x8xf32>
    %c0_42 = arith.constant 0 : index
    %c0_43 = arith.constant 0 : index
    %71 = vector.load %arg7[%c0_42, %c0_43] : memref<1x8xf32, #tpu.memory_space<vmem>>, vector<1x8xf32>
    %72 = vector.broadcast %71 : vector<1x8xf32> to vector<256x8xf32>
    %73 = arith.addf %70, %72 : vector<256x8xf32>
    %c0_44 = arith.constant 0 : index
    %c0_45 = arith.constant 0 : index
    %74 = vector.load %arg8[%c0_44, %c0_45] : memref<4x8xbf16, #tpu.memory_space<vmem>>, vector<4x8xbf16>
    %cst_46 = arith.constant dense<0.000000e+00> : vector<256x8xf32>
    %75 = tpu.matmul %1, %74, %cst_46 {dimension_numbers = #tpu.dot_dimension_numbers<[1], [0], [0], [1], [0, 0, 1, 1], [], []>} : vector<256x4xbf16>, vector<4x8xbf16>, vector<256x8xf32> -> vector<256x8xf32>
    %c0_47 = arith.constant 0 : index
    %c0_48 = arith.constant 0 : index
    %76 = vector.load %arg9[%c0_47, %c0_48] : memref<1x8xf32, #tpu.memory_space<vmem>>, vector<1x8xf32>
    %77 = vector.broadcast %76 : vector<1x8xf32> to vector<256x8xf32>
    %78 = arith.addf %75, %77 : vector<256x8xf32>
    %79 = arith.addf %73, %78 : vector<256x8xf32>
    %cst_49 = arith.constant 0.000000e+00 : f32
    %80 = vector.broadcast %cst_49 : f32 to vector<256x8xf32>
    %81 = arith.maximumf %79, %80 : vector<256x8xf32>
    %82 = arith.truncf %81 : vector<256x8xf32> to vector<256x8xbf16>
    %c0_50 = arith.constant 0 : index
    %c0_51 = arith.constant 0 : index
    %c0_52 = arith.constant 0 : index
    %83 = vector.load %arg10[%c0_50, %c0_51, %c0_52] : memref<1x256x8xbf16, #tpu.memory_space<vmem>>, vector<1x256x8xbf16>
    %84 = vector.shape_cast %83 : vector<1x256x8xbf16> to vector<256x8xbf16>
    %85 = vector.shape_cast %82 : vector<256x8xbf16> to vector<1x256x8xbf16>
    tpu.vector_store %arg10[%c0_50, %c0_51, %c0_52], %85 {strides = array<i32>} : memref<1x256x8xbf16, #tpu.memory_space<vmem>>, vector<1x256x8xbf16>,
    return
  }
  func.func @transform_0(%arg0: i32) -> (i32, i32, i32) {
    %c0_i32 = arith.constant 0 : i32
    %c0_i32_0 = arith.constant 0 : i32
    %c0_i32_1 = arith.constant 0 : i32
    return %arg0, %c0_i32, %c0_i32_0 : i32, i32, i32
  }
  func.func @transform_1(%arg0: i32) -> (i32, i32) {
    %c0_i32 = arith.constant 0 : i32
    %c0_i32_0 = arith.constant 0 : i32
    %c0_i32_1 = arith.constant 0 : i32
    return %c0_i32, %c0_i32_0 : i32, i32
  }
  func.func @transform_2(%arg0: i32) -> (i32, i32, i32) {
    %c0_i32 = arith.constant 0 : i32
    %c0_i32_0 = arith.constant 0 : i32
    %c0_i32_1 = arith.constant 0 : i32
    %c0_i32_2 = arith.constant 0 : i32
    return %c0_i32, %c0_i32_0, %c0_i32_1 : i32, i32, i32
  }
  func.func @transform_3(%arg0: i32) -> (i32, i32) {
    %c0_i32 = arith.constant 0 : i32
    %c0_i32_0 = arith.constant 0 : i32
    %c0_i32_1 = arith.constant 0 : i32
    return %c0_i32, %c0_i32_0 : i32, i32
  }
  func.func @transform_4(%arg0: i32) -> (i32, i32) {
    %c0_i32 = arith.constant 0 : i32
    %c0_i32_0 = arith.constant 0 : i32
    %c0_i32_1 = arith.constant 0 : i32
    return %c0_i32, %c0_i32_0 : i32, i32
  }
  func.func @transform_5(%arg0: i32) -> (i32, i32) {
    %c0_i32 = arith.constant 0 : i32
    %c0_i32_0 = arith.constant 0 : i32
    %c0_i32_1 = arith.constant 0 : i32
    return %c0_i32, %c0_i32_0 : i32, i32
  }
  func.func @transform_6(%arg0: i32) -> (i32, i32) {
    %c0_i32 = arith.constant 0 : i32
    %c0_i32_0 = arith.constant 0 : i32
    %c0_i32_1 = arith.constant 0 : i32
    return %c0_i32, %c0_i32_0 : i32, i32
  }
  func.func @transform_7(%arg0: i32) -> (i32, i32) {
    %c0_i32 = arith.constant 0 : i32
    %c0_i32_0 = arith.constant 0 : i32
    %c0_i32_1 = arith.constant 0 : i32
    return %c0_i32, %c0_i32_0 : i32, i32
  }
  func.func @transform_8(%arg0: i32) -> (i32, i32) {
    %c0_i32 = arith.constant 0 : i32
    %c0_i32_0 = arith.constant 0 : i32
    %c0_i32_1 = arith.constant 0 : i32
    return %c0_i32, %c0_i32_0 : i32, i32
  }
  func.func @transform_9(%arg0: i32) -> (i32, i32, i32) {
    %c0_i32 = arith.constant 0 : i32
    %c0_i32_0 = arith.constant 0 : i32
    %c0_i32_1 = arith.constant 0 : i32
    return %arg0, %c0_i32, %c0_i32_0 : i32, i32, i32
  }
}

</mosaic_0001>

<bundles_post_ra>
// kernel: tpu_custom_call.1
= control target key start
LH: loop header
LB: loop body
LE: loop exit
PB: predicated region body
PF: predicated region fallthrough
CT: control target
= control target key end

     0   :  { %s4237_s30 = smov 0   ;;  %s5390_s0 = inlined_call_operand.vmem [shape: bf16[2,256,4], index: 0, kind: input, shape index: {}]   ;;  %s5391_s1 = inlined_call_operand.vmem [shape: bf16[4,4], index: 1, kind: input, shape index: {}]   ;;  %s5392_s2 = inlined_call_operand.vmem [shape: bf16[3,12,4], index: 2, kind: input, shape index: {}]   ;;  %s5393_s3 = inlined_call_operand.vmem [shape: bf16[4,8], index: 3, kind: input, shape index: {}]   ;;  %s5394_s4 = inlined_call_operand.vmem [shape: f32[1,4], index: 4, kind: input, shape index: {}]   ;;  %s5395_s5 = inlined_call_operand.vmem [shape: f32[1,4], index: 5, kind: input, shape index: {}]   ;;  %s5396_s6 = inlined_call_operand.vmem [shape: f32[1,8], index: 6, kind: input, shape index: {}]   ;;  %s5397_s7 = inlined_call_operand.vmem [shape: bf16[4,8], index: 7, kind: input, shape index: {}]   ;;  %s5398_s8 = inlined_call_operand.vmem [shape: f32[1,8], index: 8, kind: input, shape index: {}]   ;;  %s5399_s9 = inlined_call_operand.vmem [shape: bf16[2,256,8], index: 9, kind: output, shape index: {}]  }
   0x1 LB: > { %s3298_s10 = sadd.s32 4294967295, %s4182_s30   ;;  %p3302_p0 = scmp.ge.s32.totalorder %s4182_s30, 1  ;;  %s4182_s30 = sphi %s4237_s30, %s19_s30  }
   0x2   : > { %p287_p1 = scmp.lt.s32.totalorder %s4182_s30, 3 }
   0x4   : > { %p288_p2 = pnand %p3302_p0, %p287_p1 }
   0x5   : > { %v366_v0 = vld [vmem:[%s5391_s1] sm:$0x3] (!%p288_p2)  ;;  %vm503_vm0 = vcmask (!%p288_p2), 1041408   ;;  %p323_p3 = scmp.lt.s32.totalorder (!%p288_p2), %s3298_s10, 1  ;;  %vm454_vm1 = vcmask (!%p288_p2), 31744   ;;  %v700_v18 = vlaneseq (!%p288_p2)  ;;  %s4184_s19 = smov (!%p288_p2), 4  }
   0x6   : > { %291 = sbr.rel (%p288_p2) target bundleno = 1069 (0x42d), region = 56  ;;  %3964 = vmatprep.subr.msk.bf16.mxu0 (!%p288_p2), %vm503_vm0, %v366_v0  ;;  %v505_v1 = vsel (!%p288_p2), %vm503_vm0, %v366_v0, 0  ;;  %v4298_v21 = vld [vmem:[%s5394_s4] ss:$0 sm:$0xff] (!%p288_p2)  ;;  %s4185_s20 = smov (!%p288_p2), 8   ;;  %vm1934_vm11 = vcmask (!%p288_p2), 1045504  }
   0x7   : > { %3601 = vmatpush3.bf16.msra.mxu0 (!%p288_p2), %v505_v1  ;;  %v4292_v19 = vshrl.u32 (!%p288_p2), %v700_v18, 7 }
   0x9   : > { %v702_v20 = vadd.s32 (!%p288_p2), 8, %v4292_v19  ;;  %v704_v22 = vadd.s32 (!%p288_p2), 24, %v4292_v19  ;;  %v706_v24 = vadd.s32 (!%p288_p2), 40, %v4292_v19  ;;  %v4303_v26 = vadd.s32 (!%p288_p2), 56, %v4292_v19 }
   0xa   : > { %v4306_v27 = vadd.s32 (!%p288_p2), 72, %v4292_v19  ;;  %v4310_v30 = vadd.s32 (!%p288_p2), 88, %v4292_v19  ;;  %v4313_v31 = vadd.s32 (!%p288_p2), 104, %v4292_v19  ;;  %vm1374_vm2 = vcmp.lt.s32.totalorder (!%p288_p2), %v4292_v19, 7 }
   0xb   : > { %v744_v23 = vand.u32 (!%p288_p2), 15, %v702_v20  ;;  %v758_v34 = vand.u32 (!%p288_p2), 15, %v704_v22  ;;  %vm1181_vm3 = vcmp.lt.s32.totalorder (!%p288_p2), %v4292_v19, 1  ;;  %v772_v39 = vand.u32 (!%p288_p2), 15, %v706_v24 }
   0xc   : > { %v786_v42 = vand.u32 (!%p288_p2), 15, %v4303_v26  ;;  %v800_v43 = vand.u32 (!%p288_p2), 15, %v4306_v27  ;;  %v814_v45 = vand.u32 (!%p288_p2), 15, %v4310_v30  ;;  %v828_v46 = vand.u32 (!%p288_p2), 15, %v4313_v31 }
   0xd   : > { %s5461_s10 = smov (!%p323_p3, %s3298_s10), 1  ;;  %vm4319_vm4 = vcmp.eq.s32.totalorder %v744_v23, 15  ;;  %v4333_v47 = vadd.s32 120, %v4292_v19  ;;  %vm4335_vm5 = vcmp.eq.s32.totalorder %v758_v34, 15  ;;  %v4340_v52 = vadd.s32 136, %v4292_v19 }
   0xe   : > { %s3464_s13 = sshll.u32 %s5461_s10, 7  ;;  %vm4348_vm6 = vcmp.eq.s32.totalorder %v772_v39, 15  ;;  %v4388_v20 = vadd.s32 152, %v4292_v19  ;;  %v4391_v22 = vadd.s32 168, %v4292_v19  ;;  %v4394_v23 = vadd.s32 184, %v4292_v19 }
   0xf   : > { %s4258_s16 = scalar_lea.vmem %s5390_s0, %s3464_s13  ;;  %vm4399_vm7 = vcmp.eq.s32.totalorder %v786_v42, 15  ;;  %vm4412_vm8 = vcmp.eq.s32.totalorder %v800_v43, 15  ;;  %vm4456_vm9 = vcmp.eq.s32.totalorder %v814_v45, 15  ;;  %vm4477_vm10 = vcmp.eq.s32.totalorder %v828_v46, 15  ;;  %s5293_s21 = scalar_lea.vmem %s5399_s9, %s3464_s13 }
  0x10   : > { %v4141_v2 = vld [vmem:[%s4258_s16] sm:$0xff]   ;;  %v4142_v3 = vld [vmem:[%s4258_s16 + $0x8] sm:$0xff]   ;;  %v4143_v4 = vld [vmem:[%s4258_s16 + $0x10] sm:$0xff]  }
  0x11   : > { %3602 = vmatprep.mubr.msk.bf16.mxu0 %vm454_vm1, %v4141_v2  ;;  %v4144_v5 = vld [vmem:[%s4258_s16 + $0x18] sm:$0xff]   ;;  %v4145_v6 = vld [vmem:[%s4258_s16 + $0x20] sm:$0xff]   ;;  %v4146_v7 = vld [vmem:[%s4258_s16 + $0x28] sm:$0xff]   ;;  %v842_v2 = vand.u32 15, %v4333_v47 }
  0x12   : > { %3603 = vmatmul.mubr.msk.bf16.vlgmr.msra.gmra.mrb[0].mxu0 %vm454_vm1, %v4142_v3  ;;  %v4147_v8 = vld [vmem:[%s4258_s16 + $0x30] sm:$0xff]   ;;  %v4148_v9 = vld [vmem:[%s4258_s16 + $0x38] sm:$0xff]   ;;  %v4149_v10 = vld [vmem:[%s4258_s16 + $0x40] sm:$0xff]  }
  0x13   : > { %3606 = vmatprep.mubr.msk.bf16.mxu0 %vm454_vm1, %v4143_v4  ;;  %v4150_v11 = vld [vmem:[%s4258_s16 + $0x48] sm:$0xff]   ;;  %v4151_v12 = vld [vmem:[%s4258_s16 + $0x50] sm:$0xff]   ;;  %v4152_v13 = vld [vmem:[%s4258_s16 + $0x58] sm:$0xff]   ;;  %vm4530_vm12 = vcmp.eq.s32.totalorder %v842_v2, 15 }
  0x14   : > { %v4153_v14 = vld [vmem:[%s4258_s16 + $0x60] sm:$0xff]   ;;  %v4154_v15 = vld [vmem:[%s4258_s16 + $0x68] sm:$0xff]   ;;  %v4155_v16 = vld [vmem:[%s4258_s16 + $0x70] sm:$0xff]  }
  0x15   : > { %v4156_v17 = vld [vmem:[%s4258_s16 + $0x78] sm:$0xff]  }
  0x1a   : > { %3607 = vmatmul.mubr.msk.bf16.gmra.mrb[4].mxu0 %vm454_vm1, %v4144_v5 }
  0x1b   : > { %3610 = vmatprep.mubr.msk.bf16.mxu0 %vm454_vm1, %v4145_v6 }
  0x22   : > { %3611 = vmatmul.mubr.msk.bf16.gmra.mrb[8].mxu0 %vm454_vm1, %v4146_v7 }
  0x23   : > { %3614 = vmatprep.mubr.msk.bf16.mxu0 %vm454_vm1, %v4147_v8 }
  0x2a   : > { %3615 = vmatmul.mubr.msk.bf16.gmra.mrb[12].mxu0 %vm454_vm1, %v4148_v9 }
  0x2b   : > { %3618 = vmatprep.mubr.msk.bf16.mxu0 %vm454_vm1, %v4149_v10 }
  0x32   : > { %3619 = vmatmul.mubr.msk.bf16.gmra.mrb[16].mxu0 %vm454_vm1, %v4150_v11 }
  0x33   : > { %3622 = vmatprep.mubr.msk.bf16.mxu0 %vm454_vm1, %v4151_v12 }
  0x3a   : > { %3623 = vmatmul.mubr.msk.bf16.gmra.mrb[20].mxu0 %vm454_vm1, %v4152_v13 }
  0x3b   : > { %3626 = vmatprep.mubr.msk.bf16.mxu0 %vm454_vm1, %v4153_v14 }
  0x42   : > { %3627 = vmatmul.mubr.msk.bf16.gmra.mrb[24].mxu0 %vm454_vm1, %v4154_v15 }
  0x43   : > { %3630 = vmatprep.mubr.msk.bf16.mxu0 %vm454_vm1, %v4155_v16 }
  0x4a   : > { %3631 = vmatmul.mubr.msk.bf16.gmra.mrb[28].mxu0 %vm454_vm1, %v4156_v17  ;;  %v856_v17 = vand.u32 15, %v4340_v52 }
  0x4c   : > { %vm4553_vm13 = vcmp.eq.s32.totalorder %v856_v17, 15 }
  0xe5   : > { %v3604_v25 = vpop.f32.mrb[0].mxu0 }
  0xe6   : > { %v550_v28 = vadd.f32 %v3604_v25, %v4298_v21  ;;  %v541_v29 = vpop.f32.mrb[1].mxu0 }
  0xe7   : > { %v542_v32 = vadd.f32 %v4298_v21, %v541_v29  ;;  %v3605_v33 = vpop.f32.mrb[2].mxu0 }
  0xe8   : > { %v670_v35 = vmax.f32 %v550_v28, 0.0  ;;  %v553_v36 = vadd.f32 %v3605_v33, %v4298_v21  ;;  %v544_v37 = vpop.f32.mrb[3].mxu0 }
  0xe9   : > { %v4323_v40 = vmax.f32 %v542_v32, 0.0  ;;  %v545_v41 = vadd.f32 %v4298_v21, %v544_v37 }
  0xea   : > { %v4328_v44 = vmax.f32 %v553_v36, 0.0  ;;  %v1151_v48 = vrot.slane %v670_v35, 7  ;;  %v1344_v49 = vrot.slane %v670_v35, 1 }
  0xeb   : > { %v669_v50 = vmax.f32 %v545_v41, 0.0  ;;  %v1149_v53 = vrot.slane %v4323_v40, 7  ;;  %v1342_v57 = vrot.slane %v4323_v40, 1 }
  0xec   : > { %v1152_v54 = vrot.slane %v4328_v44, 7  ;;  %v1345_v55 = vrot.slane %v4328_v44, 1  ;;  %v3986_v56 = vpack.i.bf16 %v4328_v44, %v670_v35 }
  0xed   : > { %v1150_v58 = vrot.slane %v669_v50, 7  ;;  %v1343_v59 = vrot.slane %v669_v50, 1  ;;  %v3608_v60 = vpop.f32.mrb[4].mxu0  ;;  %v3981_v61 = vpack.i.bf16 %v669_v50, %v4323_v40 }
  0xee   : > { %v566_v63 = vadd.f32 %v3608_v60, %v4298_v21  ;;  %v557_v0 = vpop.f32.mrb[5].mxu0  ;;  %v1403_v1 = vsel %vm1374_vm2, %v1344_v49, %v1345_v55  ;;  %v4358_v3 = vsel %vm1181_vm3, %v1151_v48, %v1152_v54 }
  0xef   : > { %v558_v4 = vadd.f32 %v4298_v21, %v557_v0  ;;  %v3609_v5 = vpop.f32.mrb[6].mxu0  ;;  %3982 = vrot.lane.b32.xlu0 %v3981_v61, %s4184_s19  ;;  %v1404_v6 = vsel %vm1374_vm2, %v1343_v59, %v1344_v49  ;;  %v1405_v7 = vsel %vm1374_vm2, %v1342_v57, %v1343_v59  ;;  %v4372_v8 = vsel %vm1181_vm3, %v1149_v53, %v1150_v58 }
  0xf0   : > { %v4374_v9 = vmax.f32 %v566_v63, 0.0  ;;  %v569_v10 = vadd.f32 %v3609_v5, %v4298_v21  ;;  %v560_v11 = vpop.f32.mrb[7].mxu0  ;;  %v1472_v12 = vsel %vm4319_vm4, 0.0, %v1404_v6  ;;  %v4381_v13 = vsel %vm1181_vm3, %v1150_v58, %v1151_v48 }
  0xf1   : > { %v672_v14 = vmax.f32 %v558_v4, 0.0  ;;  %v561_v15 = vadd.f32 %v4298_v21, %v560_v11  ;;  %v3991_v16 = vpack.i.bf16 %v1472_v12, %v1405_v7  ;;  %v870_v5 = vand.u32 15, %v4388_v20 }
  0xf2   : > { %v4385_v18 = vmax.f32 %v569_v10, 0.0  ;;  %v1155_v24 = vrot.slane %v4374_v9, 7  ;;  %v1348_v32 = vrot.slane %v4374_v9, 1  ;;  %v884_v7 = vand.u32 15, %v4391_v22 }
  0xf3   : > { %v1153_v25 = vrot.slane %v672_v14, 7  ;;  %v1346_v26 = vrot.slane %v672_v14, 1  ;;  %v673_v28 = vmax.f32 %v561_v15, 0.0  ;;  %3987 = vrot.lane.b32.xlu0 %v3986_v56, %s4184_s19  ;;  %3992 = vrot.lane.b32.xlu1 %v3991_v16, %s4185_s20  ;;  %vm4606_vm14 = vcmp.eq.s32.totalorder %v870_v5, 15 }
  0xf4   : > { %v1156_v33 = vrot.slane %v4385_v18, 7  ;;  %v1349_v34 = vrot.slane %v4385_v18, 1  ;;  %v4006_v35 = vpack.i.bf16 %v4385_v18, %v4374_v9  ;;  %v898_v9 = vand.u32 15, %v4394_v23 }
  0xf5   : > { %v1154_v36 = vrot.slane %v673_v28, 7  ;;  %v1347_v37 = vrot.slane %v673_v28, 1  ;;  %v3612_v38 = vpop.f32.mrb[8].mxu0  ;;  %v3996_v39 = vpack.i.bf16 %v673_v28, %v672_v14  ;;  %v1402_v41 = vsel %vm1374_vm2, %v1345_v55, %v1346_v26 }
  0xf6   : > { %v582_v44 = vadd.f32 %v3612_v38, %v4298_v21  ;;  %v573_v48 = vpop.f32.mrb[9].mxu0  ;;  %v1474_v49 = vsel %vm4335_vm5, 0.0, %v1402_v41  ;;  %v1399_v50 = vsel %vm1374_vm2, %v1348_v32, %v1349_v34  ;;  %v4423_v56 = vsel %vm1181_vm3, %v1152_v54, %v1153_v25 }
  0xf7   : > { %v574_v55 = vadd.f32 %v4298_v21, %v573_v48  ;;  %v3613_v27 = vpop.f32.mrb[10].mxu0  ;;  %3997 = vrot.lane.b32.xlu0 %v3996_v39, %s4184_s19  ;;  %v4001_v43 = vpack.i.bf16 %v1474_v49, %v1403_v1  ;;  %v1400_v58 = vsel %vm1374_vm2, %v1347_v37, %v1348_v32  ;;  %v1401_v51 = vsel %vm1374_vm2, %v1346_v26, %v1347_v37  ;;  %v4157_v48 = vld [vmem:[%s5392_s2 + $0x8] sm:$0x3f]  }
  0xf8   : > { %v4431_v59 = vmax.f32 %v582_v44, 0.0  ;;  %v585_v60 = vadd.f32 %v3613_v27, %v4298_v21  ;;  %v576_v61 = vpop.f32.mrb[11].mxu0  ;;  %v1476_v54 = vsel %vm4348_vm6, 0.0, %v1400_v58  ;;  %v4438_v63 = vsel %vm1181_vm3, %v1153_v25, %v1154_v36  ;;  %3965 = vmatprep.subr.msk.bf16.mxu1 %vm1934_vm11, %v4157_v48 }
  0xf9   : > { %v676_v0 = vmax.f32 %v574_v55, 0.0  ;;  %v577_v1 = vadd.f32 %v4298_v21, %v576_v61  ;;  %4002 = vrot.lane.b32.xlu1 %v4001_v43, %s4185_s20  ;;  %v4011_v4 = vpack.i.bf16 %v1476_v54, %v1401_v51  ;;  %v4449_v62 = vsel %vm1181_vm3, %v1155_v24, %v1156_v33  ;;  %v4516_v61 = vld [vmem:[%s5392_s2] sm:$0x3f]  }
  0xfa   : > { %v4443_v6 = vmax.f32 %v585_v60, 0.0  ;;  %v4462_v15 = vsel %vm1181_vm3, %v1154_v36, %v1155_v24  ;;  %v1352_v16 = vrot.slane %v4431_v59, 1  ;;  %v4511_v60 = vadd.s32 200, %v4292_v19 }
  0xfb   : > { %v1157_v10 = vrot.slane %v676_v0, 7  ;;  %v1350_v11 = vrot.slane %v676_v0, 1  ;;  %v4451_v12 = vmax.f32 %v577_v1, 0.0  ;;  %4012 = vrot.lane.b32.xlu0 %v4011_v4, %s4185_s20  ;;  %v1159_v42 = vrot.slane %v4431_v59, 7 }
  0xfc   : > { %v1160_v18 = vrot.slane %v4443_v6, 7  ;;  %v1353_v25 = vrot.slane %v4443_v6, 1  ;;  %v4026_v26 = vpack.i.bf16 %v4443_v6, %v4431_v59  ;;  %v1936_v59 = vsel %vm1934_vm11, %v4157_v48, 0 }
  0xfd   : > { %v1158_v28 = vrot.slane %v4451_v12, 7  ;;  %v1351_v30 = vrot.slane %v4451_v12, 1  ;;  %v3616_v45 = vpop.f32.mrb[12].mxu0  ;;  %4007 = vrot.lane.b32.xlu1 %v4006_v35, %s4184_s19  ;;  %v4016_v32 = vpack.i.bf16 %v4451_v12, %v676_v0  ;;  %v1398_v24 = vsel %vm1374_vm2, %v1349_v34, %v1350_v11  ;;  %3635 = vmatpush3.bf16.msra.mxu1 %v1936_v59 }
  0xfe   : > { %v598_v37 = vadd.f32 %v3616_v45, %v4298_v21  ;;  %v589_v38 = vpop.f32.mrb[13].mxu0  ;;  %v1478_v39 = vsel %vm4399_vm7, 0.0, %v1398_v24  ;;  %v1395_v35 = vsel %vm1374_vm2, %v1352_v16, %v1353_v25  ;;  %v4488_v41 = vsel %vm1181_vm3, %v1156_v33, %v1157_v10  ;;  %3966 = vmatprep.subr.msk.bf16.mxu1 %vm1934_vm11, %v4516_v61 }
  0xff   : > { %v590_v34 = vadd.f32 %v4298_v21, %v589_v38  ;;  %v3617_v31 = vpop.f32.mrb[14].mxu0  ;;  %4017 = vrot.lane.b32.xlu0 %v4016_v32, %s4184_s19  ;;  %v4021_v46 = vpack.i.bf16 %v1478_v39, %v1399_v50  ;;  %v1396_v44 = vsel %vm1374_vm2, %v1351_v30, %v1352_v16  ;;  %v1397_v29 = vsel %vm1374_vm2, %v1350_v11, %v1351_v30 }
 0x100   : > { %v4499_v49 = vmax.f32 %v598_v37, 0.0  ;;  %v601_v33 = vadd.f32 %v3617_v31, %v4298_v21  ;;  %v592_v55 = vpop.f32.mrb[15].mxu0  ;;  %v1480_v27 = vsel %vm4412_vm8, 0.0, %v1396_v44  ;;  %v4506_v50 = vsel %vm1181_vm3, %v1157_v10, %v1158_v28 }
 0x101   : > { %v680_v43 = vmax.f32 %v590_v34, 0.0  ;;  %v593_v58 = vadd.f32 %v4298_v21, %v592_v55  ;;  %4022 = vrot.lane.b32.xlu1 %v4021_v46, %s4185_s20  ;;  %v4031_v51 = vpack.i.bf16 %v1480_v27, %v1397_v29  ;;  %v4522_v0 = vadd.s32 216, %v4292_v19 }
 0x102   : > { %v4519_v54 = vmax.f32 %v601_v33, 0.0  ;;  %v1356_v1 = vrot.slane %v4499_v49, 1  ;;  %v4543_v47 = vsel %vm1181_vm3, %v1159_v42, %v1160_v18  ;;  %v912_v55 = vand.u32 15, %v4511_v60 }
 0x103   : > { %v1354_v4 = vrot.slane %v680_v43, 1  ;;  %v4525_v10 = vmax.f32 %v593_v58, 0.0  ;;  %4032 = vrot.lane.b32.xlu0 %v4031_v51, %s4185_s20  ;;  %v1161_v12 = vrot.slane %v680_v43, 7  ;;  %v4592_v36 = vadd.s32 248, %v4292_v19 }
 0x104   : > { %v1357_v16 = vrot.slane %v4519_v54, 1  ;;  %v4046_v30 = vpack.i.bf16 %v4519_v54, %v4499_v49  ;;  %v1164_v51 = vrot.slane %v4519_v54, 7  ;;  %vm4623_vm15 = vcmp.eq.s32.totalorder %v884_v7, 15 }
 0x105   : > { %v1162_v2 = vrot.slane %v4525_v10, 7  ;;  %v1355_v45 = vrot.slane %v4525_v10, 1  ;;  %v3620_v32 = vpop.f32.mrb[16].mxu0  ;;  %4027 = vrot.lane.b32.xlu1 %v4026_v26, %s4184_s19  ;;  %v4036_v24 = vpack.i.bf16 %v4525_v10, %v680_v43  ;;  %v1394_v37 = vsel %vm1374_vm2, %v1353_v25, %v1354_v4 }
 0x106   : > { %v614_v39 = vadd.f32 %v3620_v32, %v4298_v21  ;;  %v605_v34 = vpop.f32.mrb[17].mxu0  ;;  %v1482_v26 = vsel %vm4456_vm9, 0.0, %v1394_v37  ;;  %v1391_v31 = vsel %vm1374_vm2, %v1356_v1, %v1357_v16  ;;  %v4566_v25 = vsel %vm1181_vm3, %v1158_v28, %v1159_v42 }
 0x107   : > { %v606_v52 = vadd.f32 %v4298_v21, %v605_v34  ;;  %v3621_v17 = vpop.f32.mrb[18].mxu0  ;;  %4037 = vrot.lane.b32.xlu0 %v4036_v24, %s4184_s19  ;;  %v4041_v46 = vpack.i.bf16 %v1482_v26, %v1395_v35  ;;  %v1392_v44 = vsel %vm1374_vm2, %v1355_v45, %v1356_v1  ;;  %v1393_v14 = vsel %vm1374_vm2, %v1354_v4, %v1355_v45 }
 0x108   : > { %v4574_v29 = vmax.f32 %v614_v39, 0.0  ;;  %v617_v48 = vadd.f32 %v3621_v17, %v4298_v21  ;;  %v608_v33 = vpop.f32.mrb[19].mxu0  ;;  %v1484_v28 = vsel %vm4477_vm10, 0.0, %v1392_v44  ;;  %v4586_v58 = vsel %vm1181_vm3, %v1161_v12, %v1162_v2 }
 0x109   : > { %v684_v27 = vmax.f32 %v606_v52, 0.0  ;;  %v609_v43 = vadd.f32 %v4298_v21, %v608_v33  ;;  %4042 = vrot.lane.b32.xlu1 %v4041_v46, %s4185_s20  ;;  %v4051_v35 = vpack.i.bf16 %v1484_v28, %v1393_v14  ;;  %v4598_v1 = vsel %vm1181_vm3, %v1160_v18, %v1161_v12 }
 0x10a   : > { %v4589_v42 = vmax.f32 %v617_v48, 0.0  ;;  %v1163_v4 = vrot.slane %v4499_v49, 7  ;;  %v926_v32 = vand.u32 15, %v4522_v0  ;;  %v1360_v6 = vrot.slane %v4574_v29, 1 }
 0x10b   : > { %v1358_v59 = vrot.slane %v684_v27, 1  ;;  %v4601_v45 = vmax.f32 %v609_v43, 0.0  ;;  %4052 = vrot.lane.b32.xlu0 %v4051_v35, %s4185_s20  ;;  %v1165_v24 = vrot.slane %v684_v27, 7  ;;  %v954_v38 = vand.u32 15, %v4592_v36 }
 0x10c   : > { %v1361_v18 = vrot.slane %v4589_v42, 1  ;;  %v4066_v49 = vpack.i.bf16 %v4589_v42, %v4574_v29  ;;  %v4634_v46 = vsel %vm1181_vm3, %v1163_v4, %v1164_v51  ;;  %vm4674_vm4 = vcmp.eq.s32.totalorder %v898_v9, 15 }
 0x10d   : > { %v1166_v12 = vrot.slane %v4601_v45, 7  ;;  %v1359_v37 = vrot.slane %v4601_v45, 1  ;;  %v3624_v39 = vpop.f32.mrb[20].mxu0  ;;  %4047 = vrot.lane.b32.xlu1 %v4046_v30, %s4184_s19  ;;  %v4056_v20 = vpack.i.bf16 %v4601_v45, %v684_v27  ;;  %v1390_v5 = vsel %vm1374_vm2, %v1357_v16, %v1358_v59 }
 0x10e   : > { %v630_v26 = vadd.f32 %v3624_v39, %v4298_v21  ;;  %v621_v52 = vpop.f32.mrb[21].mxu0  ;;  %v1486_v17 = vsel %vm4530_vm12, 0.0, %v1390_v5  ;;  %v1387_v30 = vsel %vm1374_vm2, %v1360_v6, %v1361_v18  ;;  %v4651_v27 = vsel %vm1181_vm3, %v1162_v2, %v1163_v4 }
 0x10f   : > { %v622_v16 = vadd.f32 %v4298_v21, %v621_v52  ;;  %v3625_v22 = vpop.f32.mrb[22].mxu0  ;;  %4057 = vrot.lane.b32.xlu0 %v4056_v20, %s4184_s19  ;;  %v4061_v7 = vpack.i.bf16 %v1486_v17, %v1391_v31  ;;  %v1388_v44 = vsel %vm1374_vm2, %v1359_v37, %v1360_v6  ;;  %v1389_v11 = vsel %vm1374_vm2, %v1358_v59, %v1359_v37 }
 0x110   : > { %v4642_v14 = vmax.f32 %v630_v26, 0.0  ;;  %v633_v48 = vadd.f32 %v3625_v22, %v4298_v21  ;;  %v624_v33 = vpop.f32.mrb[23].mxu0  ;;  %v1488_v28 = vsel %vm4553_vm13, 0.0, %v1388_v44  ;;  %v4656_v59 = vadd.s32 232, %v4292_v19 }
 0x111   : > { %v688_v31 = vmax.f32 %v622_v16, 0.0  ;;  %v625_v43 = vadd.f32 %v4298_v21, %v624_v33  ;;  %4062 = vrot.lane.b32.xlu1 %v4061_v7, %s4185_s20  ;;  %v4071_v35 = vpack.i.bf16 %v1488_v28, %v1389_v11  ;;  %v1168_v6 = vrot.slane %v4589_v42, 7 }
 0x112   : > { %v4659_v37 = vmax.f32 %v633_v48, 0.0  ;;  %v4666_v10 = vsel %vm1181_vm3, %v1165_v24, %v1166_v12  ;;  %v1167_v2 = vrot.slane %v4574_v29, 7  ;;  %v4680_v36 = vsel %vm1181_vm3, %v1164_v51, %v1165_v24 }
 0x113   : > { %v1362_v4 = vrot.slane %v688_v31, 1  ;;  %v4669_v39 = vmax.f32 %v625_v43, 0.0  ;;  %4072 = vrot.lane.b32.xlu0 %v4071_v35, %s4185_s20  ;;  %v1364_v20 = vrot.slane %v4642_v14, 1  ;;  %v1169_v5 = vrot.slane %v688_v31, 7 }
 0x114   : > { %v1365_v29 = vrot.slane %v4659_v37, 1  ;;  %v4086_v26 = vpack.i.bf16 %v4659_v37, %v4642_v14  ;;  %v4699_v44 = vsel %vm1181_vm3, %v1167_v2, %v1168_v6  ;;  %v4716_v35 = vsel %vm1181_vm3, %v1166_v12, %v1167_v2 }
 0x115   : > { %v1170_v52 = vrot.slane %v4669_v39, 7  ;;  %v1363_v23 = vrot.slane %v4669_v39, 1  ;;  %v3628_v9 = vpop.f32.mrb[24].mxu0  ;;  %4067 = vrot.lane.b32.xlu1 %v4066_v49, %s4184_s19  ;;  %v4076_v17 = vpack.i.bf16 %v4669_v39, %v688_v31  ;;  %v1386_v51 = vsel %vm1374_vm2, %v1361_v18, %v1362_v4 }
 0x116   : > { %v646_v24 = vadd.f32 %v3628_v9, %v4298_v21  ;;  %v637_v16 = vpop.f32.mrb[25].mxu0  ;;  %v1490_v22 = vsel %vm4606_vm14, 0.0, %v1386_v51  ;;  %v1383_v7 = vsel %vm1374_vm2, %v1364_v20, %v1365_v29  ;;  %vm4722_vm5 = vcmp.eq.s32.totalorder %v912_v55, 15 }
 0x117   : > { %v638_v49 = vadd.f32 %v4298_v21, %v637_v16  ;;  %v3629_v11 = vpop.f32.mrb[26].mxu0  ;;  %4077 = vrot.lane.b32.xlu0 %v4076_v17, %s4184_s19  ;;  %v4081_v48 = vpack.i.bf16 %v1490_v22, %v1387_v30  ;;  %v1384_v18 = vsel %vm1374_vm2, %v1363_v23, %v1364_v20  ;;  %v1385_v54 = vsel %vm1374_vm2, %v1362_v4, %v1363_v23 }
 0x118   : > { %v4707_v33 = vmax.f32 %v646_v24, 0.0  ;;  %v649_v28 = vadd.f32 %v3629_v11, %v4298_v21  ;;  %v640_v31 = vpop.f32.mrb[27].mxu0  ;;  %v1492_v43 = vsel %vm4623_vm15, 0.0, %v1384_v18  ;;  %v1172_v34 = vrot.slane %v4659_v37, 7 }
 0x119   : > { %v692_v30 = vmax.f32 %v638_v49, 0.0  ;;  %v641_v20 = vadd.f32 %v4298_v21, %v640_v31  ;;  %4082 = vrot.lane.b32.xlu1 %v4081_v48, %s4185_s20  ;;  %v4091_v4 = vpack.i.bf16 %v1492_v43, %v1385_v54  ;;  %v940_v45 = vand.u32 15, %v4656_v59 }
 0x11a   : > { %v4727_v9 = vmax.f32 %v649_v28, 0.0  ;;  %v4734_v12 = vsel %vm1181_vm3, %v1169_v5, %v1170_v52  ;;  %v1171_v2 = vrot.slane %v4642_v14, 7  ;;  %vm4742_vm6 = vcmp.eq.s32.totalorder %v926_v32, 15 }
 0x11b   : > { %v1366_v17 = vrot.slane %v692_v30, 1  ;;  %v4737_v60 = vmax.f32 %v641_v20, 0.0  ;;  %4092 = vrot.lane.b32.xlu0 %v4091_v4, %s4185_s20  ;;  %v4748_v59 = vsel %vm1181_vm3, %v1168_v6, %v1169_v5  ;;  %v1368_v37 = vrot.slane %v4707_v33, 1 }
 0x11c   : > { %v1173_v51 = vrot.slane %v692_v30, 7  ;;  %v1369_v14 = vrot.slane %v4727_v9, 1  ;;  %v4106_v24 = vpack.i.bf16 %v4727_v9, %v4707_v33  ;;  %vm4754_vm7 = vcmp.eq.s32.totalorder %v954_v38, 15 }
 0x11d   : > { %v1174_v0 = vrot.slane %v4737_v60, 7  ;;  %v1367_v32 = vrot.slane %v4737_v60, 1  ;;  %v3632_v22 = vpop.f32.mrb[28].mxu0  ;;  %4087 = vrot.lane.b32.xlu1 %v4086_v26, %s4184_s19  ;;  %v4096_v6 = vpack.i.bf16 %v4737_v60, %v692_v30  ;;  %v1382_v5 = vsel %vm1374_vm2, %v1365_v29, %v1366_v17 }
 0x11e   : > { %v662_v49 = vadd.f32 %v3632_v22, %v4298_v21  ;;  %v653_v11 = vpop.f32.mrb[29].mxu0  ;;  %v1494_v38 = vsel %vm4674_vm4, 0.0, %v1382_v5  ;;  %v1379_v48 = vsel %vm1374_vm2, %v1368_v37, %v1369_v14  ;;  %v4771_v18 = vsel %vm1181_vm3, %v1171_v2, %v1172_v34 }
 0x11f   : > { %v654_v26 = vadd.f32 %v4298_v21, %v653_v11  ;;  %v3633_v54 = vpop.f32.mrb[30].mxu0  ;;  %4097 = vrot.lane.b32.xlu0 %v4096_v6, %s4184_s19  ;;  %v4101_v28 = vpack.i.bf16 %v1494_v38, %v1383_v7  ;;  %v1380_v29 = vsel %vm1374_vm2, %v1367_v32, %v1368_v37  ;;  %v1381_v42 = vsel %vm1374_vm2, %v1366_v17, %v1367_v32 }
 0x120   : > { %v698_v31 = vmax.f32 %v662_v49, 0.0  ;;  %v665_v43 = vadd.f32 %v3633_v54, %v4298_v21  ;;  %v656_v30 = vpop.f32.mrb[31].mxu0  ;;  %v1496_v20 = vsel %vm4722_vm5, 0.0, %v1380_v29  ;;  %v4786_v4 = vsel %vm1181_vm3, %v1170_v52, %v1171_v2 }
 0x121   : > { %v696_v7 = vmax.f32 %v654_v26, 0.0  ;;  %v657_v60 = vadd.f32 %v4298_v21, %v656_v30  ;;  %4102 = vrot.lane.b32.xlu1 %v4101_v28, %s4185_s20  ;;  %v4111_v37 = vpack.i.bf16 %v1496_v20, %v1381_v42  ;;  %vm4790_vm8 = vcmp.eq.s32.totalorder %v940_v45, 15 }
 0x122   : > { %v1175_v32 = vrot.slane %v4707_v33, 7  ;;  %v1176_v23 = vrot.slane %v4727_v9, 7  ;;  %v699_v22 = vmax.f32 %v665_v43, 0.0  ;;  %v4798_v39 = vsel %vm1181_vm3, %v1173_v51, %v1174_v0 }
 0x123   : > { %v1372_v52 = vrot.slane %v698_v31, 1  ;;  %v1370_v2 = vrot.slane %v696_v7, 1  ;;  %v697_v6 = vmax.f32 %v657_v60, 0.0  ;;  %4112 = vrot.lane.b32.xlu0 %v4111_v37, %s4185_s20  ;;  %v4803_v21 = vsel %vm1181_vm3, %v1172_v34, %v1173_v51 }
 0x124   : > { %v1177_v45 = vrot.slane %v696_v7, 7  ;;  %v1180_v5 = vrot.slane %v699_v22, 7  ;;  %v1373_v49 = vrot.slane %v699_v22, 1  ;;  %v4126_v33 = vpack.i.bf16 %v699_v22, %v698_v31 }
 0x125   : > { %v1178_v11 = vrot.slane %v697_v6, 7  ;;  %v1371_v9 = vrot.slane %v697_v6, 1  ;;  %4107 = vrot.lane.b32.xlu1 %v4106_v24, %s4184_s19  ;;  %v4116_v38 = vpack.i.bf16 %v697_v6, %v696_v7  ;;  %v1378_v26 = vsel %vm1374_vm2, %v1369_v14, %v1370_v2 }
 0x126   : > { %v1498_v54 = vsel %vm4742_vm6, 0.0, %v1378_v26  ;;  %v1375_v28 = vsel %vm1374_vm2, %v1372_v52, %v1373_v49  ;;  %v1406_v34 = vsel %vm1374_vm2, %v1373_v49, %v1342_v57  ;;  %v1213_v51 = vsel %vm1181_vm3, %v1180_v5, %v1149_v53 }
 0x127   : > { %4117 = vrot.lane.b32.xlu0 %v4116_v38, %s4184_s19  ;;  %v4121_v24 = vpack.i.bf16 %v1498_v54, %v1379_v48  ;;  %v1376_v55 = vsel %vm1374_vm2, %v1371_v9, %v1372_v52  ;;  %v1377_v14 = vsel %vm1374_vm2, %v1370_v2, %v1371_v9  ;;  %v1502_v29 = vsel %vm4754_vm7, 0.0, %v1406_v34 }
 0x128   : > { %v1179_v42 = vrot.slane %v698_v31, 7  ;;  %v1500_v57 = vsel %vm4790_vm8, 0.0, %v1376_v55  ;;  %v4136_v40 = vpack.i.bf16 %v1502_v29, %v1375_v28  ;;  %v4831_v53 = vsel %vm1181_vm3, %v1175_v32, %v1176_v23 }
 0x129   : > { %4122 = vrot.lane.b32.xlu1 %v4121_v24, %s4185_s20  ;;  %v4131_v48 = vpack.i.bf16 %v1500_v57, %v1377_v14  ;;  %v4836_v43 = vsel %vm1181_vm3, %v1174_v0, %v1175_v32  ;;  %v4840_v16 = vsel %vm1181_vm3, %v1177_v45, %v1178_v11  ;;  %v4844_v31 = vsel %vm1181_vm3, %v1176_v23, %v1177_v45 }
 0x12a   : > { %v4848_v30 = vsel %vm1181_vm3, %v1179_v42, %v1180_v5  ;;  %v4852_v20 = vsel %vm1181_vm3, %v1178_v11, %v1179_v42  ;;  %vm1840_vm2 = vcmask 97280   ;;  %v4186_v0 = vmov 0  }
 0x12b   : > { %4132 = vrot.lane.b32.xlu0 %v4131_v48, %s4185_s20  ;;  %1841 = vst.msk [vmem:[#allocation2] sm:$0xff] %vm1840_vm2, %v4186_v0  ;;  %1842 = vst.msk [vmem:[#allocation2 + $0x88] sm:$0xff] %vm1840_vm2, %v4186_v0  ;;  %v737_v7 = vand.u32 15, %v4292_v19  ;;  %v703_v60 = vadd.s32 16, %v4292_v19  ;;  %v705_v17 = vadd.s32 32, %v4292_v19  ;;  %vm1791_vm9 = vcmask 64512  }
 0x12c   : > { %v707_v54 = vadd.s32 48, %v4292_v19  ;;  %v709_v55 = vadd.s32 64, %v4292_v19 }
 0x12d   : > { %4127 = vrot.lane.b32.xlu1 %v4126_v33, %s4184_s19  ;;  %vm1117_vm3 = vcmp.eq.s32.totalorder %v737_v7, 0  ;;  %v751_v22 = vand.u32 15, %v703_v60  ;;  %v765_v49 = vand.u32 15, %v705_v17 }
 0x12e   : > { %v1278_v6 = vsel %vm1117_vm3, 0.0, %v1213_v51  ;;  %v779_v0 = vand.u32 15, %v707_v54 }
 0x12f   : > { %vm4865_vm10 = vcmp.eq.s32.totalorder %v751_v22, 0  ;;  %vm4873_vm12 = vcmp.eq.s32.totalorder %v765_v49, 0 }
 0x130   : > { %v1280_v57 = vsel %vm4865_vm10, 0.0, %v4381_v13  ;;  %vm4894_vm13 = vcmp.eq.s32.totalorder %v779_v0, 0 }
 0x131   : > { %4137 = vrot.lane.b32.xlu1 %v4136_v40, %s4185_s20 }
 0x161   : > { %v3983_v37 = vpop.permute.xlu0 %3982 }
 0x162   : > { %v3985_v32 = vunpack.i.h.bf16 %v3983_v37  ;;  %v3984_v23 = vunpack.i.l.bf16 %v3983_v37  ;;  %v1282_v37 = vsel %vm4873_vm12, 0.0, %v4423_v56 }
 0x164   : > { %v1759_v33 = vsel %vm454_vm1, %v1278_v6, %v3984_v23  ;;  %v1760_v11 = vsel %vm454_vm1, %v4372_v8, %v3985_v32  ;;  %v793_v32 = vand.u32 15, %v709_v55  ;;  %v1284_v55 = vsel %vm4894_vm13, 0.0, %v4462_v15 }
 0x165   : > { %v3988_v52 = vpop.permute.xlu0 %3987  ;;  %v3993_v2 = vpop.permute.xlu1 %3992 }
 0x166   : > { %v3995_v45 = vunpack.i.h.bf16 %v3993_v2  ;;  %v3994_v5 = vunpack.i.l.bf16 %v3993_v2  ;;  %v3990_v28 = vunpack.i.h.bf16 %v3988_v52  ;;  %v3989_v34 = vunpack.i.l.bf16 %v3988_v52 }
 0x167   : > { %vm4901_vm14 = vcmp.eq.s32.totalorder %v793_v32, 0 }
 0x168   : > { %v1792_v38 = vsel %vm1791_vm9, %v1759_v33, %v3994_v5  ;;  %v1793_v26 = vsel %vm1791_vm9, %v1760_v11, %v3995_v45  ;;  %v1762_v7 = vsel %vm454_vm1, %v4358_v3, %v3990_v28  ;;  %v1761_v60 = vsel %vm454_vm1, %v1280_v57, %v3989_v34 }
 0x169   : > { %v1824_v51 = vpack.c.bf16 %v1793_v26, %v1792_v38  ;;  %v3998_v24 = vpop.permute.xlu0 %3997  ;;  %v711_v33 = vadd.s32 80, %v4292_v19  ;;  %v713_v26 = vadd.s32 96, %v4292_v19 }
 0x16a   : > { %v4000_v8 = vunpack.i.h.bf16 %v3998_v24  ;;  %v3999_v29 = vunpack.i.l.bf16 %v3998_v24 }
 0x16b   : > { %1843 = vst.msk [vmem:[#allocation2 + $0x8] sm:$0xff] %vm1840_vm2, %v1824_v51  ;;  %v4003_v42 = vpop.permute.xlu1 %4002  ;;  %v821_v0 = vand.u32 15, %v713_v26 }
 0x16c   : > { %v4005_v40 = vunpack.i.h.bf16 %v4003_v42  ;;  %v4004_v48 = vunpack.i.l.bf16 %v4003_v42  ;;  %v1764_v2 = vsel %vm454_vm1, %v4438_v63, %v4000_v8  ;;  %v1763_v6 = vsel %vm454_vm1, %v1282_v37, %v3999_v29 }
 0x16d   : > { %v4013_v17 = vpop.permute.xlu0 %4012  ;;  %v807_v29 = vand.u32 15, %v711_v33  ;;  %vm4944_vm4 = vcmp.eq.s32.totalorder %v821_v0, 0 }
 0x16e   : > { %v1795_v23 = vsel %vm1791_vm9, %v1762_v7, %v4005_v40  ;;  %v1794_v22 = vsel %vm1791_vm9, %v1761_v60, %v4004_v48  ;;  %v4015_v52 = vunpack.i.h.bf16 %v4013_v17  ;;  %v4014_v13 = vunpack.i.l.bf16 %v4013_v17 }
 0x16f   : > { %v1825_v3 = vpack.c.bf16 %v1795_v23, %v1794_v22  ;;  %v4008_v45 = vpop.permute.xlu1 %4007  ;;  %v1286_v40 = vsel %vm4901_vm14, 0.0, %v4488_v41  ;;  %v2108_v22 = vsel %vm1934_vm11, %v4516_v61, 0  ;;  %v4929_v41 = vld [vmem:[%s5392_s2 + $0x10] sm:$0x3f]   ;;  %vm4933_vm15 = vcmp.eq.s32.totalorder %v807_v29, 0 }
 0x170   : > { %v1796_v5 = vsel %vm1791_vm9, %v1763_v6, %v4014_v13  ;;  %v1797_v49 = vsel %vm1791_vm9, %v1764_v2, %v4015_v52  ;;  %v4010_v9 = vunpack.i.h.bf16 %v4008_v45  ;;  %v4009_v38 = vunpack.i.l.bf16 %v4008_v45 }
 0x171   : > { %1844 = vst.msk [vmem:[#allocation2 + $0x10] sm:$0xff] %vm1840_vm2, %v1825_v3  ;;  %v1826_v11 = vpack.c.bf16 %v1797_v49, %v1796_v5  ;;  %v4018_v63 = vpop.permute.xlu0 %4017  ;;  %v715_v6 = vadd.s32 112, %v4292_v19  ;;  %v717_v49 = vadd.s32 128, %v4292_v19 }
 0x172   : > { %v4905_v28 = vld [vmem:[#allocation2 + $0x8] sm:$0xff]  ;;  %v4020_v34 = vunpack.i.h.bf16 %v4018_v63  ;;  %v4019_v51 = vunpack.i.l.bf16 %v4018_v63  ;;  %v1766_v42 = vsel %vm454_vm1, %v4449_v62, %v4010_v9  ;;  %v1765_v57 = vsel %vm454_vm1, %v1284_v55, %v4009_v38 }
 0x173   : > { %1845 = vst.msk [vmem:[#allocation2 + $0x18] sm:$0xff] %vm1840_vm2, %v1826_v11  ;;  %v4023_v24 = vpop.permute.xlu1 %4022  ;;  %3636 = vmatprep.mubr.msk.bf16.mxu1 %vm1840_vm2, %v4905_v28  ;;  %v1288_v63 = vsel %vm4933_vm15, 0.0, %v4566_v25  ;;  %v1290_v55 = vsel %vm4944_vm4, 0.0, %v4598_v1 }
 0x174   : > { %v4025_v14 = vunpack.i.h.bf16 %v4023_v24  ;;  %v4024_v8 = vunpack.i.l.bf16 %v4023_v24  ;;  %v1768_v17 = vsel %vm454_vm1, %v4506_v50, %v4020_v34  ;;  %v1767_v32 = vsel %vm454_vm1, %v1286_v40, %v4019_v51 }
 0x175   : > { %v4033_v48 = vpop.permute.xlu0 %4032  ;;  %v835_v34 = vand.u32 15, %v715_v6 }
 0x176   : > { %v1798_v7 = vsel %vm1791_vm9, %v1765_v57, %v4024_v8  ;;  %v1799_v60 = vsel %vm1791_vm9, %v1766_v42, %v4025_v14  ;;  %v4035_v37 = vunpack.i.h.bf16 %v4033_v48  ;;  %v4034_v15 = vunpack.i.l.bf16 %v4033_v48 }
 0x177   : > { %v1827_v62 = vpack.c.bf16 %v1799_v60, %v1798_v7  ;;  %v4028_v23 = vpop.permute.xlu1 %4027  ;;  %v849_v8 = vand.u32 15, %v717_v49  ;;  %vm4971_vm5 = vcmp.eq.s32.totalorder %v835_v34, 0 }
 0x178   : > { %v1800_v52 = vsel %vm1791_vm9, %v1767_v32, %v4034_v15  ;;  %v1801_v13 = vsel %vm1791_vm9, %v1768_v17, %v4035_v37  ;;  %v4937_v50 = vld [vmem:[#allocation2 + $0x10] sm:$0xff]  ;;  %v4030_v3 = vunpack.i.h.bf16 %v4028_v23  ;;  %v4029_v45 = vunpack.i.l.bf16 %v4028_v23 }
 0x179   : > { %1846 = vst.msk [vmem:[#allocation2 + $0x20] sm:$0xff] %vm1840_vm2, %v1827_v62  ;;  %v1828_v61 = vpack.c.bf16 %v1801_v13, %v1800_v52  ;;  %v4038_v5 = vpop.permute.xlu0 %4037  ;;  %3637 = vmatmul.mubr.msk.bf16.vlgmr.msra.gmra.mrb[0].mxu1 %vm1840_vm2, %v4937_v50  ;;  %v719_v15 = vadd.s32 144, %v4292_v19  ;;  %v721_v23 = vadd.s32 160, %v4292_v19  ;;  %vm4982_vm6 = vcmp.eq.s32.totalorder %v849_v8, 0 }
 0x17a   : > { %3669 = vmatpush3.bf16.msra.mxu1 %v2108_v22  ;;  %v4948_v33 = vld [vmem:[#allocation2 + $0x18] sm:$0xff]  ;;  %v4040_v11 = vunpack.i.h.bf16 %v4038_v5  ;;  %v4039_v9 = vunpack.i.l.bf16 %v4038_v5  ;;  %v1770_v51 = vsel %vm454_vm1, %v4543_v47, %v4030_v3  ;;  %v1769_v24 = vsel %vm454_vm1, %v1288_v63, %v4029_v45 }
 0x17b   : > { %1847 = vst.msk [vmem:[#allocation2 + $0x28] sm:$0xff] %vm1840_vm2, %v1828_v61  ;;  %v4043_v38 = vpop.permute.xlu1 %4042  ;;  %3640 = vmatprep.mubr.msk.bf16.mxu1 %vm1840_vm2, %v4948_v33  ;;  %3967 = vmatprep.subr.msk.bf16.mxu1 %vm1934_vm11, %v4929_v41  ;;  %v1292_v61 = vsel %vm4971_vm5, 0.0, %v4651_v27  ;;  %v863_v5 = vand.u32 15, %v719_v15 }
 0x17c   : > { %v4045_v26 = vunpack.i.h.bf16 %v4043_v38  ;;  %v4044_v54 = vunpack.i.l.bf16 %v4043_v38  ;;  %v1772_v40 = vsel %vm454_vm1, %v4586_v58, %v4040_v11  ;;  %v1771_v48 = vsel %vm454_vm1, %v1290_v55, %v4039_v9 }
 0x17d   : > { %v4053_v14 = vpop.permute.xlu0 %4052  ;;  %v1294_v11 = vsel %vm4982_vm6, 0.0, %v4680_v36  ;;  %v877_v38 = vand.u32 15, %v721_v23  ;;  %vm5007_vm7 = vcmp.eq.s32.totalorder %v863_v5, 0 }
 0x17e   : > { %v1802_v29 = vsel %vm1791_vm9, %v1769_v24, %v4044_v54  ;;  %v1803_v42 = vsel %vm1791_vm9, %v1770_v51, %v4045_v26  ;;  %v4055_v57 = vunpack.i.h.bf16 %v4053_v14  ;;  %v4054_v25 = vunpack.i.l.bf16 %v4053_v14 }
 0x17f   : > { %v1829_v47 = vpack.c.bf16 %v1803_v42, %v1802_v29  ;;  %v4048_v0 = vpop.permute.xlu1 %4047  ;;  %v723_v29 = vadd.s32 176, %v4292_v19  ;;  %vm5018_vm8 = vcmp.eq.s32.totalorder %v877_v38, 0  ;;  %v1296_v1 = vsel %vm5007_vm7, 0.0, %v4716_v35 }
 0x180   : > { %v1804_v7 = vsel %vm1791_vm9, %v1771_v48, %v4054_v25  ;;  %v1805_v60 = vsel %vm1791_vm9, %v1772_v40, %v4055_v57  ;;  %v4975_v37 = vld [vmem:[#allocation2 + $0x20] sm:$0xff]  ;;  %v4050_v58 = vunpack.i.h.bf16 %v4048_v0  ;;  %v4049_v32 = vunpack.i.l.bf16 %v4048_v0 }
 0x181   : > { %1848 = vst.msk [vmem:[#allocation2 + $0x30] sm:$0xff] %vm1840_vm2, %v1829_v47  ;;  %v1830_v17 = vpack.c.bf16 %v1805_v60, %v1804_v7  ;;  %v4058_v62 = vpop.permute.xlu0 %4057  ;;  %3641 = vmatmul.mubr.msk.bf16.gmra.mrb[4].mxu1 %vm1840_vm2, %v4975_v37  ;;  %v725_v40 = vadd.s32 192, %v4292_v19  ;;  %v1298_v23 = vsel %vm5018_vm8, 0.0, %v4748_v59 }
 0x182   : > { %v4986_v52 = vld [vmem:[#allocation2 + $0x28] sm:$0xff]  ;;  %v4060_v13 = vunpack.i.h.bf16 %v4058_v62  ;;  %v4059_v2 = vunpack.i.l.bf16 %v4058_v62  ;;  %v1774_v49 = vsel %vm454_vm1, %v4634_v46, %v4050_v58  ;;  %v1773_v56 = vsel %vm454_vm1, %v1292_v61, %v4049_v32 }
 0x183   : > { %1849 = vst.msk [vmem:[#allocation2 + $0x38] sm:$0xff] %vm1840_vm2, %v1830_v17  ;;  %v4063_v6 = vpop.permute.xlu1 %4062  ;;  %3644 = vmatprep.mubr.msk.bf16.mxu1 %vm1840_vm2, %v4986_v52  ;;  %v891_v58 = vand.u32 15, %v723_v29 }
 0x184   : > { %v4065_v3 = vunpack.i.h.bf16 %v4063_v6  ;;  %v4064_v45 = vunpack.i.l.bf16 %v4063_v6  ;;  %v1776_v34 = vsel %vm454_vm1, %v4666_v10, %v4060_v13  ;;  %v1775_v51 = vsel %vm454_vm1, %v1294_v11, %v4059_v2 }
 0x185   : > { %v4073_v9 = vpop.permute.xlu0 %4072  ;;  %v905_v13 = vand.u32 15, %v725_v40  ;;  %vm5043_vm3 = vcmp.eq.s32.totalorder %v891_v58, 0 }
 0x186   : > { %v1806_v63 = vsel %vm1791_vm9, %v1773_v56, %v4064_v45  ;;  %v1807_v26 = vsel %vm1791_vm9, %v1774_v49, %v4065_v3  ;;  %v4075_v54 = vunpack.i.h.bf16 %v4073_v9  ;;  %v4074_v27 = vunpack.i.l.bf16 %v4073_v9 }
 0x187   : > { %v1831_v46 = vpack.c.bf16 %v1807_v26, %v1806_v63  ;;  %v4068_v24 = vpop.permute.xlu1 %4067  ;;  %v727_v9 = vadd.s32 208, %v4292_v19  ;;  %vm5054_vm10 = vcmp.eq.s32.totalorder %v905_v13, 0  ;;  %v731_v13 = vadd.s32 240, %v4292_v19 }
 0x188   : > { %v1808_v55 = vsel %vm1791_vm9, %v1775_v51, %v4074_v27  ;;  %v1809_v14 = vsel %vm1791_vm9, %v1776_v34, %v4075_v54  ;;  %v5011_v8 = vld [vmem:[#allocation2 + $0x30] sm:$0xff]  ;;  %v4070_v10 = vunpack.i.h.bf16 %v4068_v24  ;;  %v4069_v57 = vunpack.i.l.bf16 %v4068_v24 }
 0x189   : > { %1850 = vst.msk [vmem:[#allocation2 + $0x40] sm:$0xff] %vm1840_vm2, %v1831_v46  ;;  %v1832_v42 = vpack.c.bf16 %v1809_v14, %v1808_v55  ;;  %v4078_v25 = vpop.permute.xlu0 %4077  ;;  %3645 = vmatmul.mubr.msk.bf16.gmra.mrb[8].mxu1 %vm1840_vm2, %v5011_v8  ;;  %v729_v54 = vadd.s32 224, %v4292_v19  ;;  %v1300_v55 = vsel %vm5043_vm3, 0.0, %v4786_v4  ;;  %v919_v29 = vand.u32 15, %v727_v9 }
 0x18a   : > { %v5022_v47 = vld [vmem:[#allocation2 + $0x38] sm:$0xff]  ;;  %v4080_v0 = vunpack.i.h.bf16 %v4078_v25  ;;  %v4079_v7 = vunpack.i.l.bf16 %v4078_v25  ;;  %v1778_v32 = vsel %vm454_vm1, %v4699_v44, %v4070_v10  ;;  %v1777_v62 = vsel %vm454_vm1, %v1296_v1, %v4069_v57 }
 0x18b   : > { %1851 = vst.msk [vmem:[#allocation2 + $0x48] sm:$0xff] %vm1840_vm2, %v1832_v42  ;;  %v4083_v60 = vpop.permute.xlu1 %4082  ;;  %3648 = vmatprep.mubr.msk.bf16.mxu1 %vm1840_vm2, %v5022_v47  ;;  %v1302_v57 = vsel %vm5054_vm10, 0.0, %v4803_v21  ;;  %v933_v40 = vand.u32 15, %v729_v54  ;;  %vm5079_vm12 = vcmp.eq.s32.totalorder %v919_v29, 0  ;;  %v947_v9 = vand.u32 15, %v731_v13 }
 0x18c   : > { %v4085_v15 = vunpack.i.h.bf16 %v4083_v60  ;;  %v4084_v17 = vunpack.i.l.bf16 %v4083_v60  ;;  %v1780_v3 = vsel %vm454_vm1, %v4734_v12, %v4080_v0  ;;  %v1779_v45 = vsel %vm454_vm1, %v1298_v23, %v4079_v7 }
 0x18d   : > { %v4093_v22 = vpop.permute.xlu0 %4092  ;;  %vm5089_vm13 = vcmp.eq.s32.totalorder %v933_v40, 0  ;;  %vm1147_vm14 = vcmp.eq.s32.totalorder %v947_v9, 0 }
 0x18e   : > { %v1810_v2 = vsel %vm1791_vm9, %v1777_v62, %v4084_v17  ;;  %v1811_v6 = vsel %vm1791_vm9, %v1778_v32, %v4085_v15  ;;  %v4095_v61 = vunpack.i.h.bf16 %v4093_v22  ;;  %v4094_v35 = vunpack.i.l.bf16 %v4093_v22 }
 0x18f   : > { %v1833_v44 = vpack.c.bf16 %v1811_v6, %v1810_v2  ;;  %v4088_v5 = vpop.permute.xlu1 %4087  ;;  %v1308_v29 = vsel %vm1147_vm14, 0.0, %v4852_v20  ;;  %v1859_v20 = vld [vmem:[#allocation2] sm:$0xff] }
 0x190   : > { %v1812_v49 = vsel %vm1791_vm9, %v1779_v45, %v4094_v35  ;;  %v1813_v56 = vsel %vm1791_vm9, %v1780_v3, %v4095_v61  ;;  %v5047_v11 = vld [vmem:[#allocation2 + $0x40] sm:$0xff]  ;;  %v4090_v12 = vunpack.i.h.bf16 %v4088_v5  ;;  %v4089_v63 = vunpack.i.l.bf16 %v4088_v5 }
 0x191   : > { %1852 = vst.msk [vmem:[#allocation2 + $0x50] sm:$0xff] %vm1840_vm2, %v1833_v44  ;;  %v1834_v38 = vpack.c.bf16 %v1813_v56, %v1812_v49  ;;  %v4098_v26 = vpop.permute.xlu0 %4097  ;;  %3649 = vmatmul.mubr.msk.bf16.gmra.mrb[12].mxu1 %vm1840_vm2, %v5047_v11  ;;  %v1304_v45 = vsel %vm5079_vm12, 0.0, %v4836_v43  ;;  %v1306_v56 = vsel %vm5089_vm13, 0.0, %v4844_v31 }
 0x192   : > { %v5058_v34 = vld [vmem:[#allocation2 + $0x48] sm:$0xff]  ;;  %v4100_v51 = vunpack.i.h.bf16 %v4098_v26  ;;  %v4099_v46 = vunpack.i.l.bf16 %v4098_v26  ;;  %v1782_v42 = vsel %vm454_vm1, %v4771_v18, %v4090_v12  ;;  %v1781_v10 = vsel %vm454_vm1, %v1300_v55, %v4089_v63 }
 0x193   : > { %1853 = vst.msk [vmem:[#allocation2 + $0x58] sm:$0xff] %vm1840_vm2, %v1834_v38  ;;  %v4103_v24 = vpop.permute.xlu1 %4102  ;;  %3652 = vmatprep.mubr.msk.bf16.mxu1 %vm1840_vm2, %v5058_v34 }
 0x194   : > { %v4105_v14 = vunpack.i.h.bf16 %v4103_v24  ;;  %v4104_v36 = vunpack.i.l.bf16 %v4103_v24  ;;  %v1784_v60 = vsel %vm454_vm1, %v4798_v39, %v4100_v51  ;;  %v1783_v1 = vsel %vm454_vm1, %v1302_v57, %v4099_v46 }
 0x195   : > { %v4113_v25 = vpop.permute.xlu0 %4112 }
 0x196   : > { %v1814_v48 = vsel %vm1791_vm9, %v1781_v10, %v4104_v36  ;;  %v1815_v0 = vsel %vm1791_vm9, %v1782_v42, %v4105_v14  ;;  %v4115_v7 = vunpack.i.h.bf16 %v4113_v25  ;;  %v4114_v4 = vunpack.i.l.bf16 %v4113_v25 }
 0x197   : > { %v1835_v18 = vpack.c.bf16 %v1815_v0, %v1814_v48  ;;  %v4108_v15 = vpop.permute.xlu1 %4107 }
 0x198   : > { %v1816_v17 = vsel %vm1791_vm9, %v1783_v1, %v4114_v4  ;;  %v1817_v58 = vsel %vm1791_vm9, %v1784_v60, %v4115_v7  ;;  %v5083_v32 = vld [vmem:[#allocation2 + $0x50] sm:$0xff]  ;;  %v4110_v23 = vunpack.i.h.bf16 %v4108_v15  ;;  %v4109_v22 = vunpack.i.l.bf16 %v4108_v15 }
 0x199   : > { %1854 = vst.msk [vmem:[#allocation2 + $0x60] sm:$0xff] %vm1840_vm2, %v1835_v18  ;;  %v1836_v62 = vpack.c.bf16 %v1817_v58, %v1816_v17  ;;  %v4118_v39 = vpop.permute.xlu0 %4117  ;;  %3653 = vmatmul.mubr.msk.bf16.gmra.mrb[16].mxu1 %vm1840_vm2, %v5083_v32  ;;  %v2344_v18 = vsel %vm1934_vm11, %v4929_v41, 0  ;;  %v2846_v41 = vld [vmem:[%s5397_s7] sm:$0x3] }
 0x19a   : > { %v5093_v6 = vld [vmem:[#allocation2 + $0x58] sm:$0xff]  ;;  %v4120_v61 = vunpack.i.h.bf16 %v4118_v39  ;;  %v4119_v35 = vunpack.i.l.bf16 %v4118_v39  ;;  %v1786_v5 = vsel %vm454_vm1, %v4831_v53, %v4110_v23  ;;  %v1785_v49 = vsel %vm454_vm1, %v1304_v45, %v4109_v22 }
 0x19b   : > { %1855 = vst.msk [vmem:[#allocation2 + $0x68] sm:$0xff] %vm1840_vm2, %v1836_v62  ;;  %v4123_v3 = vpop.permute.xlu1 %4122  ;;  %3656 = vmatprep.mubr.msk.bf16.mxu1 %vm1840_vm2, %v5093_v6  ;;  %v2855_v2 = vsel %vm503_vm0, %v2846_v41, 0 }
 0x19c   : > { %v4125_v44 = vunpack.i.h.bf16 %v4123_v3  ;;  %v4124_v19 = vunpack.i.l.bf16 %v4123_v3  ;;  %v1788_v43 = vsel %vm454_vm1, %v4840_v16, %v4120_v61  ;;  %v1787_v54 = vsel %vm454_vm1, %v1306_v56, %v4119_v35 }
 0x19d   : > { %v4133_v59 = vpop.permute.xlu0 %4132 }
 0x19e   : > { %v1818_v38 = vsel %vm1791_vm9, %v1785_v49, %v4124_v19  ;;  %v1819_v12 = vsel %vm1791_vm9, %v1786_v5, %v4125_v44  ;;  %v4135_v63 = vunpack.i.h.bf16 %v4133_v59  ;;  %v4134_v26 = vunpack.i.l.bf16 %v4133_v59 }
 0x19f   : > { %v1837_v53 = vpack.c.bf16 %v1819_v12, %v1818_v38  ;;  %v4128_v27 = vpop.permute.xlu1 %4127 }
 0x1a0   : > { %v1820_v51 = vsel %vm1791_vm9, %v1787_v54, %v4134_v26  ;;  %v1821_v46 = vsel %vm1791_vm9, %v1788_v43, %v4135_v63  ;;  %v1871_v31 = vld [vmem:[#allocation2 + $0x60] sm:$0xff]  ;;  %v4130_v55 = vunpack.i.h.bf16 %v4128_v27  ;;  %v4129_v14 = vunpack.i.l.bf16 %v4128_v27 }
 0x1a1   : > { %1856 = vst.msk [vmem:[#allocation2 + $0x70] sm:$0xff] %vm1840_vm2, %v1837_v53  ;;  %v1838_v24 = vpack.c.bf16 %v1821_v46, %v1820_v51  ;;  %3657 = vmatmul.mubr.msk.bf16.gmra.mrb[20].mxu1 %vm1840_vm2, %v1871_v31 }
 0x1a2   : > { %v1872_v36 = vld [vmem:[#allocation2 + $0x68] sm:$0xff]  ;;  %v1790_v57 = vsel %vm454_vm1, %v4848_v30, %v4130_v55  ;;  %v1789_v25 = vsel %vm454_vm1, %v1308_v29, %v4129_v14  ;;  %v2626_v30 = vld [vmem:[%s5393_s3] sm:$0x3] }
 0x1a3   : > { %1857 = vst.msk [vmem:[#allocation2 + $0x78] sm:$0xff] %vm1840_vm2, %v1838_v24  ;;  %v4138_v16 = vpop.permute.xlu1 %4137  ;;  %3660 = vmatprep.mubr.msk.bf16.mxu1 %vm1840_vm2, %v1872_v36  ;;  %3968 = vmatprep.subr.msk.bf16.mxu0 %vm503_vm0, %v2626_v30  ;;  %v2683_v1 = vsel %vm503_vm0, %v2626_v30, 0 }
 0x1a4   : > { %v4140_v42 = vunpack.i.h.bf16 %v4138_v16  ;;  %v4139_v10 = vunpack.i.l.bf16 %v4138_v16  ;;  %3737 = vmatpush3.bf16.msra.mxu0 %v2683_v1 }
 0x1a5   : > { %3969 = vmatprep.subr.msk.bf16.mxu0 %vm503_vm0, %v2846_v41  ;;  %vm3210_vm0 = vcmask 60416  }
 0x1a6   : > { %v1822_v40 = vsel %vm1791_vm9, %v1789_v25, %v4139_v10  ;;  %v1823_v48 = vsel %vm1791_vm9, %v1790_v57, %v4140_v42 }
 0x1a7   : > { %v1839_v0 = vpack.c.bf16 %v1823_v48, %v1822_v40 }
 0x1a8   : > { %v1873_v7 = vld [vmem:[#allocation2 + $0x70] sm:$0xff] }
 0x1a9   : > { %1858 = vst.msk [vmem:[#allocation2 + $0x80] sm:$0xff] %vm1840_vm2, %v1839_v0  ;;  %3661 = vmatmul.mubr.msk.bf16.gmra.mrb[24].mxu1 %vm1840_vm2, %v1873_v7 }
 0x1aa   : > { %v1874_v4 = vld [vmem:[#allocation2 + $0x78] sm:$0xff] }
 0x1ab   : > { %3664 = vmatprep.mubr.msk.bf16.mxu1 %vm1840_vm2, %v1874_v4 }
 0x1b0   : > { %v1877_v60 = vld [vmem:[#allocation2 + $0x80] sm:$0xff] }
 0x1b1   : > { %3665 = vmatmul.mubr.msk.bf16.gmra.mrb[28].mxu1 %vm1840_vm2, %v1877_v60 }
 0x1b2   : > { %3670 = vmatprep.mubr.msk.bf16.mxu1 %vm1840_vm2, %v1859_v20 }
 0x1b9   : > { %3671 = vmatmul.mubr.msk.bf16.vlgmr.msra.gmra.mrb[0].mxu1 %vm1840_vm2, %v4905_v28  ;;  %v2286_v28 = vld [vmem:[#allocation2 + $0x88] sm:$0xff] }
 0x1ba   : > { %3703 = vmatpush3.bf16.msra.mxu1 %v2344_v18  ;;  %3674 = vmatprep.mubr.msk.bf16.mxu1 %vm1840_vm2, %v4937_v50 }
 0x1c1   : > { %3675 = vmatmul.mubr.msk.bf16.gmra.mrb[4].mxu1 %vm1840_vm2, %v4948_v33 }
 0x1c2   : > { %3678 = vmatprep.mubr.msk.bf16.mxu1 %vm1840_vm2, %v4975_v37 }
 0x1c9   : > { %3679 = vmatmul.mubr.msk.bf16.gmra.mrb[8].mxu1 %vm1840_vm2, %v4986_v52 }
 0x1ca   : > { %3682 = vmatprep.mubr.msk.bf16.mxu1 %vm1840_vm2, %v5011_v8 }
 0x1d1   : > { %3683 = vmatmul.mubr.msk.bf16.gmra.mrb[12].mxu1 %vm1840_vm2, %v5022_v47 }
 0x1d2   : > { %3686 = vmatprep.mubr.msk.bf16.mxu1 %vm1840_vm2, %v5047_v11 }
 0x1d9   : > { %3687 = vmatmul.mubr.msk.bf16.gmra.mrb[16].mxu1 %vm1840_vm2, %v5058_v34 }
 0x1da   : > { %3690 = vmatprep.mubr.msk.bf16.mxu1 %vm1840_vm2, %v5083_v32 }
 0x1e1   : > { %3691 = vmatmul.mubr.msk.bf16.gmra.mrb[20].mxu1 %vm1840_vm2, %v5093_v6 }
 0x1e2   : > { %3694 = vmatprep.mubr.msk.bf16.mxu1 %vm1840_vm2, %v1871_v31 }
 0x1e9   : > { %3695 = vmatmul.mubr.msk.bf16.gmra.mrb[24].mxu1 %vm1840_vm2, %v1872_v36 }
 0x1ea   : > { %3698 = vmatprep.mubr.msk.bf16.mxu1 %vm1840_vm2, %v1873_v7 }
 0x1f1   : > { %3699 = vmatmul.mubr.msk.bf16.gmra.mrb[28].mxu1 %vm1840_vm2, %v1874_v4 }
 0x1f2   : > { %3704 = vmatprep.mubr.msk.bf16.mxu1 %vm1840_vm2, %v4937_v50  ;;  %v5195_v50 = vld [vmem:[%s5395_s5] ss:$0 sm:$0xff] }
 0x1f9   : > { %3705 = vmatmul.mubr.msk.bf16.vlgmr.msra.gmra.mrb[0].mxu1 %vm1840_vm2, %v4948_v33 }
 0x1fa   : > { %3708 = vmatprep.mubr.msk.bf16.mxu1 %vm1840_vm2, %v4975_v37 }
 0x201   : > { %3709 = vmatmul.mubr.msk.bf16.gmra.mrb[4].mxu1 %vm1840_vm2, %v4986_v52 }
 0x202   : > { %3712 = vmatprep.mubr.msk.bf16.mxu1 %vm1840_vm2, %v5011_v8 }
 0x209   : > { %3713 = vmatmul.mubr.msk.bf16.gmra.mrb[8].mxu1 %vm1840_vm2, %v5022_v47 }
 0x20a   : > { %3716 = vmatprep.mubr.msk.bf16.mxu1 %vm1840_vm2, %v5047_v11 }
 0x211   : > { %3717 = vmatmul.mubr.msk.bf16.gmra.mrb[12].mxu1 %vm1840_vm2, %v5058_v34 }
 0x212   : > { %3720 = vmatprep.mubr.msk.bf16.mxu1 %vm1840_vm2, %v5083_v32 }
 0x219   : > { %3721 = vmatmul.mubr.msk.bf16.gmra.mrb[16].mxu1 %vm1840_vm2, %v5093_v6 }
 0x21a   : > { %3724 = vmatprep.mubr.msk.bf16.mxu1 %vm1840_vm2, %v1871_v31 }
 0x221   : > { %3725 = vmatmul.mubr.msk.bf16.gmra.mrb[20].mxu1 %vm1840_vm2, %v1872_v36 }
 0x222   : > { %3728 = vmatprep.mubr.msk.bf16.mxu1 %vm1840_vm2, %v1873_v7 }
 0x229   : > { %3729 = vmatmul.mubr.msk.bf16.gmra.mrb[24].mxu1 %vm1840_vm2, %v1874_v4 }
 0x22a   : > { %3732 = vmatprep.mubr.msk.bf16.mxu1 %vm1840_vm2, %v1877_v60 }
 0x231   : > { %3733 = vmatmul.mubr.msk.bf16.gmra.mrb[28].mxu1 %vm1840_vm2, %v2286_v28 }
 0x2cc   : > { %v3706_v33 = vpop.f32.mrb[0].mxu1 }
 0x2cd   : > { %v2548_v37 = vadd.f32 %v3706_v33, %v5195_v50  ;;  %v2380_v52 = vpop.f32.mrb[1].mxu1 }
 0x2ce   : > { %v2546_v8 = vadd.f32 %v5195_v50, %v2380_v52  ;;  %v3707_v47 = vpop.f32.mrb[2].mxu1 }
 0x2cf   : > { %v2549_v11 = vadd.f32 %v3707_v47, %v5195_v50  ;;  %v2383_v34 = vpop.f32.mrb[3].mxu1  ;;  %v2580_v17 = vmax.f32 %v2548_v37, 0.0 }
 0x2d0   : > { %v2547_v15 = vadd.f32 %v5195_v50, %v2383_v34  ;;  %v2578_v21 = vmax.f32 %v2546_v8, 0.0 }
 0x2d1   : > { %v2581_v58 = vmax.f32 %v2549_v11, 0.0 }
 0x2d2   : > { %v2579_v32 = vmax.f32 %v2547_v15, 0.0 }
 0x2d3   : > { %v2611_v62 = vpack.c.bf16 %v2581_v58, %v2580_v17 }
 0x2d4   : > { %v2610_v23 = vpack.c.bf16 %v2579_v32, %v2578_v21  ;;  %v3710_v22 = vpop.f32.mrb[4].mxu1 }
 0x2d5   : > { %v2552_v39 = vadd.f32 %v3710_v22, %v5195_v50  ;;  %v2396_v13 = vpop.f32.mrb[5].mxu1 }
 0x2d6   : > { %v2550_v6 = vadd.f32 %v5195_v50, %v2396_v13  ;;  %v3711_v61 = vpop.f32.mrb[6].mxu1  ;;  %3738 = vmatprep.mubr.msk.bf16.mxu0 %vm454_vm1, %v2610_v23 }
 0x2d7   : > { %v2553_v35 = vadd.f32 %v3711_v61, %v5195_v50  ;;  %v2399_v3 = vpop.f32.mrb[7].mxu1  ;;  %3739 = vmatmul.mubr.msk.bf16.vlgmr.msra.gmra.mrb[32].mxu0 %vm454_vm1, %v2611_v62  ;;  %v2584_v44 = vmax.f32 %v2552_v39, 0.0 }
 0x2d8   : > { %v2551_v45 = vadd.f32 %v5195_v50, %v2399_v3  ;;  %3771 = vmatpush3.bf16.msra.mxu0 %v2855_v2  ;;  %v2582_v5 = vmax.f32 %v2550_v6, 0.0 }
 0x2d9   : > { %v2585_v19 = vmax.f32 %v2553_v35, 0.0 }
 0x2da   : > { %v2583_v49 = vmax.f32 %v2551_v45, 0.0 }
 0x2db   : > { %v2613_v56 = vpack.c.bf16 %v2585_v19, %v2584_v44 }
 0x2dc   : > { %v2612_v59 = vpack.c.bf16 %v2583_v49, %v2582_v5  ;;  %v3714_v9 = vpop.f32.mrb[8].mxu1 }
 0x2dd   : > { %v2556_v38 = vadd.f32 %v3714_v9, %v5195_v50  ;;  %v2412_v12 = vpop.f32.mrb[9].mxu1 }
 0x2de   : > { %v2554_v63 = vadd.f32 %v5195_v50, %v2412_v12  ;;  %v3715_v26 = vpop.f32.mrb[10].mxu1  ;;  %3742 = vmatprep.mubr.msk.bf16.mxu0 %vm454_vm1, %v2612_v59 }
 0x2df   : > { %v2557_v43 = vadd.f32 %v3715_v26, %v5195_v50  ;;  %v2415_v54 = vpop.f32.mrb[11].mxu1  ;;  %3743 = vmatmul.mubr.msk.bf16.gmra.mrb[36].mxu0 %vm454_vm1, %v2613_v56  ;;  %v2588_v27 = vmax.f32 %v2556_v38, 0.0 }
 0x2e0   : > { %v2555_v53 = vadd.f32 %v5195_v50, %v2415_v54  ;;  %v2586_v46 = vmax.f32 %v2554_v63, 0.0 }
 0x2e1   : > { %v2589_v51 = vmax.f32 %v2557_v43, 0.0 }
 0x2e2   : > { %v2587_v31 = vmax.f32 %v2555_v53, 0.0 }
 0x2e3   : > { %v2615_v24 = vpack.c.bf16 %v2589_v51, %v2588_v27 }
 0x2e4   : > { %v2614_v55 = vpack.c.bf16 %v2587_v31, %v2586_v46  ;;  %v3718_v14 = vpop.f32.mrb[12].mxu1 }
 0x2e5   : > { %v2560_v36 = vadd.f32 %v3718_v14, %v5195_v50  ;;  %v2428_v16 = vpop.f32.mrb[13].mxu1 }
 0x2e6   : > { %v2558_v29 = vadd.f32 %v5195_v50, %v2428_v16  ;;  %v3719_v42 = vpop.f32.mrb[14].mxu1  ;;  %3746 = vmatprep.mubr.msk.bf16.mxu0 %vm454_vm1, %v2614_v55 }
 0x2e7   : > { %v2561_v10 = vadd.f32 %v3719_v42, %v5195_v50  ;;  %v2431_v57 = vpop.f32.mrb[15].mxu1  ;;  %3747 = vmatmul.mubr.msk.bf16.gmra.mrb[40].mxu0 %vm454_vm1, %v2615_v24  ;;  %v2592_v40 = vmax.f32 %v2560_v36, 0.0 }
 0x2e8   : > { %v2559_v25 = vadd.f32 %v5195_v50, %v2431_v57  ;;  %v2590_v0 = vmax.f32 %v2558_v29, 0.0 }
 0x2e9   : > { %v2593_v48 = vmax.f32 %v2561_v10, 0.0 }
 0x2ea   : > { %v2591_v7 = vmax.f32 %v2559_v25, 0.0  ;;  %v4160_v25 = vld [vmem:[%s4258_s16] sm:$0xff]  }
 0x2eb   : > { %v2617_v4 = vpack.c.bf16 %v2593_v48, %v2592_v40  ;;  %v4161_v40 = vld [vmem:[%s4258_s16 + $0x8] sm:$0xff]   ;;  %v4163_v48 = vld [vmem:[%s4258_s16 + $0x18] sm:$0xff]  }
 0x2ec   : > { %v2616_v20 = vpack.c.bf16 %v2591_v7, %v2590_v0  ;;  %v3722_v60 = vpop.f32.mrb[16].mxu1  ;;  %v4164_v0 = vld [vmem:[%s4258_s16 + $0x20] sm:$0xff]   ;;  %v4165_v7 = vld [vmem:[%s4258_s16 + $0x28] sm:$0xff]  }
 0x2ed   : > { %v2564_v30 = vadd.f32 %v3722_v60, %v5195_v50  ;;  %v2444_v1 = vpop.f32.mrb[17].mxu1  ;;  %v4168_v60 = vld [vmem:[%s4258_s16 + $0x40] sm:$0xff]  }
 0x2ee   : > { %v2562_v18 = vadd.f32 %v5195_v50, %v2444_v1  ;;  %v3723_v28 = vpop.f32.mrb[18].mxu1  ;;  %3750 = vmatprep.mubr.msk.bf16.mxu0 %vm454_vm1, %v2616_v20  ;;  %v4167_v20 = vld [vmem:[%s4258_s16 + $0x38] sm:$0xff]   ;;  %v4170_v1 = vld [vmem:[%s4258_s16 + $0x50] sm:$0xff]  }
 0x2ef   : > { %v2565_v41 = vadd.f32 %v3723_v28, %v5195_v50  ;;  %v2447_v33 = vpop.f32.mrb[19].mxu1  ;;  %3751 = vmatmul.mubr.msk.bf16.gmra.mrb[44].mxu0 %vm454_vm1, %v2617_v4  ;;  %v2596_v52 = vmax.f32 %v2564_v30, 0.0  ;;  %v4166_v4 = vld [vmem:[%s4258_s16 + $0x30] sm:$0xff]   ;;  %v4169_v30 = vld [vmem:[%s4258_s16 + $0x48] sm:$0xff]   ;;  %v4172_v28 = vld [vmem:[%s4258_s16 + $0x60] sm:$0xff]  }
 0x2f0   : > { %v2563_v37 = vadd.f32 %v5195_v50, %v2447_v33  ;;  %v2594_v47 = vmax.f32 %v2562_v18, 0.0  ;;  %v4171_v18 = vld [vmem:[%s4258_s16 + $0x58] sm:$0xff]   ;;  %v4174_v33 = vld [vmem:[%s4258_s16 + $0x70] sm:$0xff]  }
 0x2f1   : > { %v2597_v8 = vmax.f32 %v2565_v41, 0.0  ;;  %v4173_v41 = vld [vmem:[%s4258_s16 + $0x68] sm:$0xff]  }
 0x2f2   : > { %v2595_v11 = vmax.f32 %v2563_v37, 0.0  ;;  %v4175_v37 = vld [vmem:[%s4258_s16 + $0x78] sm:$0xff]  }
 0x2f3   : > { %v2619_v34 = vpack.c.bf16 %v2597_v8, %v2596_v52  ;;  %v3396_v52 = vld [vmem:[%s5396_s6] ss:$0 sm:$0xff] }
 0x2f4   : > { %v2618_v15 = vpack.c.bf16 %v2595_v11, %v2594_v47  ;;  %v3726_v17 = vpop.f32.mrb[20].mxu1  ;;  %v3413_v8 = vld [vmem:[%s5398_s8] ss:$0 sm:$0xff] }
 0x2f5   : > { %v2568_v58 = vadd.f32 %v3726_v17, %v5195_v50  ;;  %v2460_v21 = vpop.f32.mrb[21].mxu1  ;;  %v5284_v47 = vadd.f32 %v3413_v8, %v3396_v52 }
 0x2f6   : > { %v2566_v32 = vadd.f32 %v5195_v50, %v2460_v21  ;;  %v3727_v62 = vpop.f32.mrb[22].mxu1  ;;  %3754 = vmatprep.mubr.msk.bf16.mxu0 %vm454_vm1, %v2618_v15 }
 0x2f7   : > { %v2569_v23 = vadd.f32 %v3727_v62, %v5195_v50  ;;  %v2463_v22 = vpop.f32.mrb[23].mxu1  ;;  %3755 = vmatmul.mubr.msk.bf16.gmra.mrb[48].mxu0 %vm454_vm1, %v2619_v34  ;;  %v2600_v13 = vmax.f32 %v2568_v58, 0.0 }
 0x2f8   : > { %v2567_v39 = vadd.f32 %v5195_v50, %v2463_v22  ;;  %v2598_v6 = vmax.f32 %v2566_v32, 0.0 }
 0x2f9   : > { %v2601_v2 = vmax.f32 %v2569_v23, 0.0 }
 0x2fa   : > { %v2599_v61 = vmax.f32 %v2567_v39, 0.0 }
 0x2fb   : > { %v2621_v35 = vpack.c.bf16 %v2601_v2, %v2600_v13 }
 0x2fc   : > { %v2620_v3 = vpack.c.bf16 %v2599_v61, %v2598_v6  ;;  %v3730_v45 = vpop.f32.mrb[24].mxu1 }
 0x2fd   : > { %v2572_v44 = vadd.f32 %v3730_v45, %v5195_v50  ;;  %v2476_v19 = vpop.f32.mrb[25].mxu1 }
 0x2fe   : > { %v2570_v5 = vadd.f32 %v5195_v50, %v2476_v19  ;;  %v3731_v49 = vpop.f32.mrb[26].mxu1  ;;  %3758 = vmatprep.mubr.msk.bf16.mxu0 %vm454_vm1, %v2620_v3 }
 0x2ff   : > { %v2573_v56 = vadd.f32 %v3731_v49, %v5195_v50  ;;  %v2479_v59 = vpop.f32.mrb[27].mxu1  ;;  %3759 = vmatmul.mubr.msk.bf16.gmra.mrb[52].mxu0 %vm454_vm1, %v2621_v35  ;;  %v2604_v38 = vmax.f32 %v2572_v44, 0.0 }
 0x300   : > { %v2571_v9 = vadd.f32 %v5195_v50, %v2479_v59  ;;  %v2602_v63 = vmax.f32 %v2570_v5, 0.0 }
 0x301   : > { %v2605_v12 = vmax.f32 %v2573_v56, 0.0 }
 0x302   : > { %v2603_v26 = vmax.f32 %v2571_v9, 0.0 }
 0x303   : > { %v2623_v43 = vpack.c.bf16 %v2605_v12, %v2604_v38 }
 0x304   : > { %v2622_v54 = vpack.c.bf16 %v2603_v26, %v2602_v63  ;;  %v3734_v53 = vpop.f32.mrb[28].mxu1 }
 0x305   : > { %v2576_v27 = vadd.f32 %v3734_v53, %v5195_v50  ;;  %v2492_v51 = vpop.f32.mrb[29].mxu1 }
 0x306   : > { %v2574_v46 = vadd.f32 %v5195_v50, %v2492_v51  ;;  %v3735_v31 = vpop.f32.mrb[30].mxu1  ;;  %3762 = vmatprep.mubr.msk.bf16.mxu0 %vm454_vm1, %v2622_v54 }
 0x307   : > { %v2577_v24 = vadd.f32 %v3735_v31, %v5195_v50  ;;  %v2495_v55 = vpop.f32.mrb[31].mxu1  ;;  %3763 = vmatmul.mubr.msk.bf16.gmra.mrb[56].mxu0 %vm454_vm1, %v2623_v43  ;;  %v2608_v36 = vmax.f32 %v2576_v27, 0.0 }
 0x308   : > { %v2575_v14 = vadd.f32 %v5195_v50, %v2495_v55  ;;  %v2606_v29 = vmax.f32 %v2574_v46, 0.0  ;;  %v4162_v50 = vld [vmem:[%s4258_s16 + $0x10] sm:$0xff]  }
 0x309   : > { %v2609_v16 = vmax.f32 %v2577_v24, 0.0 }
 0x30a   : > { %v2607_v42 = vmax.f32 %v2575_v14, 0.0 }
 0x30b   : > { %v2625_v10 = vpack.c.bf16 %v2609_v16, %v2608_v36 }
 0x30c   : > { %v2624_v57 = vpack.c.bf16 %v2607_v42, %v2606_v29 }
 0x30e   : > { %3766 = vmatprep.mubr.msk.bf16.mxu0 %vm454_vm1, %v2624_v57 }
 0x30f   : > { %3767 = vmatmul.mubr.msk.bf16.gmra.mrb[60].mxu0 %vm454_vm1, %v2625_v10 }
 0x310   : > { %3772 = vmatprep.mubr.msk.bf16.mxu0 %vm454_vm1, %v4160_v25 }
 0x317   : > { %3773 = vmatmul.mubr.msk.bf16.vlgmr.msra.gmra.mrb[32].mxu0 %vm454_vm1, %v4161_v40 }
 0x318   : > { %3776 = vmatprep.mubr.msk.bf16.mxu0 %vm454_vm1, %v4162_v50 }
 0x31f   : > { %3777 = vmatmul.mubr.msk.bf16.gmra.mrb[36].mxu0 %vm454_vm1, %v4163_v48 }
 0x320   : > { %3780 = vmatprep.mubr.msk.bf16.mxu0 %vm454_vm1, %v4164_v0 }
 0x327   : > { %3781 = vmatmul.mubr.msk.bf16.gmra.mrb[40].mxu0 %vm454_vm1, %v4165_v7 }
 0x328   : > { %3784 = vmatprep.mubr.msk.bf16.mxu0 %vm454_vm1, %v4166_v4 }
 0x32f   : > { %3785 = vmatmul.mubr.msk.bf16.gmra.mrb[44].mxu0 %vm454_vm1, %v4167_v20 }
 0x330   : > { %3788 = vmatprep.mubr.msk.bf16.mxu0 %vm454_vm1, %v4168_v60 }
 0x337   : > { %3789 = vmatmul.mubr.msk.bf16.gmra.mrb[48].mxu0 %vm454_vm1, %v4169_v30 }
 0x338   : > { %3792 = vmatprep.mubr.msk.bf16.mxu0 %vm454_vm1, %v4170_v1 }
 0x33f   : > { %3793 = vmatmul.mubr.msk.bf16.gmra.mrb[52].mxu0 %vm454_vm1, %v4171_v18 }
 0x340   : > { %3796 = vmatprep.mubr.msk.bf16.mxu0 %vm454_vm1, %v4172_v28 }
 0x347   : > { %3797 = vmatmul.mubr.msk.bf16.gmra.mrb[56].mxu0 %vm454_vm1, %v4173_v41 }
 0x348   : > { %3800 = vmatprep.mubr.msk.bf16.mxu0 %vm454_vm1, %v4174_v33 }
 0x34f   : > { %3801 = vmatmul.mubr.msk.bf16.gmra.mrb[60].mxu0 %vm454_vm1, %v4175_v37 }
 0x3ea   : > { %v3774_v11 = vpop.f32.mrb[32].mxu0 }
 0x3eb   : > { %v3804_v34 = vadd.f32 %v3774_v11, %v3396_v52  ;;  %v2891_v15 = vpop.f32.mrb[33].mxu0 }
 0x3ec   : > { %v3806_v17 = vadd.f32 %v3396_v52, %v2891_v15  ;;  %v3775_v58 = vpop.f32.mrb[34].mxu0 }
 0x3ed   : > { %v3805_v21 = vadd.f32 %v3804_v34, %v3413_v8  ;;  %v3809_v32 = vadd.f32 %v5284_v47, %v3775_v58  ;;  %v2894_v62 = vpop.f32.mrb[35].mxu0 }
 0x3ee   : > { %v3807_v23 = vadd.f32 %v3806_v17, %v3413_v8  ;;  %v3811_v22 = vadd.f32 %v5284_v47, %v2894_v62 }
 0x3ef   : > { %v3052_v39 = vmax.f32 %v3805_v21, 0.0  ;;  %v3053_v13 = vmax.f32 %v3809_v32, 0.0 }
 0x3f0   : > { %v3050_v2 = vmax.f32 %v3807_v23, 0.0  ;;  %v3051_v6 = vmax.f32 %v3811_v22, 0.0 }
 0x3f1   : > { %v3468_v61 = vpack.c.bf16 %v3052_v39, %v3052_v39  ;;  %v3469_v35 = vpack.c.bf16 %v3053_v13, %v3053_v13 }
 0x3f2   : > { %v3466_v3 = vpack.c.bf16 %v3050_v2, %v3050_v2  ;;  %v3467_v45 = vpack.c.bf16 %v3051_v6, %v3051_v6  ;;  %v3778_v44 = vpop.f32.mrb[36].mxu0 }
 0x3f3   : > { %3213 = vst.msk [vmem:[%s5293_s21 + $0x8] sm:$0xf] %vm3210_vm0, %v3468_v61  ;;  %3214 = vst.msk [vmem:[%s5293_s21 + $0xc] sm:$0xf] %vm3210_vm0, %v3469_v35  ;;  %v3813_v19 = vadd.f32 %v5284_v47, %v3778_v44  ;;  %v2907_v5 = vpop.f32.mrb[37].mxu0 }
 0x3f4   : > { %3211 = vst.msk [vmem:[%s5293_s21] sm:$0xf] %vm3210_vm0, %v3466_v3  ;;  %3212 = vst.msk [vmem:[%s5293_s21 + $0x4] sm:$0xf] %vm3210_vm0, %v3467_v45  ;;  %v3815_v49 = vadd.f32 %v5284_v47, %v2907_v5  ;;  %v3779_v56 = vpop.f32.mrb[38].mxu0 }
 0x3f5   : > { %v3056_v59 = vmax.f32 %v3813_v19, 0.0  ;;  %v3817_v9 = vadd.f32 %v5284_v47, %v3779_v56  ;;  %v2910_v38 = vpop.f32.mrb[39].mxu0 }
 0x3f6   : > { %v3054_v12 = vmax.f32 %v3815_v49, 0.0  ;;  %v3819_v63 = vadd.f32 %v5284_v47, %v2910_v38 }
 0x3f7   : > { %v3472_v26 = vpack.c.bf16 %v3056_v59, %v3056_v59  ;;  %v3057_v43 = vmax.f32 %v3817_v9, 0.0 }
 0x3f8   : > { %v3470_v54 = vpack.c.bf16 %v3054_v12, %v3054_v12  ;;  %v3055_v53 = vmax.f32 %v3819_v63, 0.0 }
 0x3f9   : > { %3217 = vst.msk [vmem:[%s5293_s21 + $0x18] sm:$0xf] %vm3210_vm0, %v3472_v26  ;;  %v3473_v27 = vpack.c.bf16 %v3057_v43, %v3057_v43 }
 0x3fa   : > { %3215 = vst.msk [vmem:[%s5293_s21 + $0x10] sm:$0xf] %vm3210_vm0, %v3470_v54  ;;  %v3471_v51 = vpack.c.bf16 %v3055_v53, %v3055_v53  ;;  %v3782_v46 = vpop.f32.mrb[40].mxu0 }
 0x3fb   : > { %3218 = vst.msk [vmem:[%s5293_s21 + $0x1c] sm:$0xf] %vm3210_vm0, %v3473_v27  ;;  %v3821_v31 = vadd.f32 %v5284_v47, %v3782_v46  ;;  %v2923_v24 = vpop.f32.mrb[41].mxu0 }
 0x3fc   : > { %3216 = vst.msk [vmem:[%s5293_s21 + $0x14] sm:$0xf] %vm3210_vm0, %v3471_v51  ;;  %v3823_v55 = vadd.f32 %v5284_v47, %v2923_v24  ;;  %v3783_v14 = vpop.f32.mrb[42].mxu0 }
 0x3fd   : > { %v3060_v36 = vmax.f32 %v3821_v31, 0.0  ;;  %v3825_v16 = vadd.f32 %v5284_v47, %v3783_v14  ;;  %v2926_v29 = vpop.f32.mrb[43].mxu0 }
 0x3fe   : > { %v3058_v42 = vmax.f32 %v3823_v55, 0.0  ;;  %v3827_v10 = vadd.f32 %v5284_v47, %v2926_v29 }
 0x3ff   : > { %v3476_v57 = vpack.c.bf16 %v3060_v36, %v3060_v36  ;;  %v3061_v25 = vmax.f32 %v3825_v16, 0.0 }
 0x400   : > { %v3474_v40 = vpack.c.bf16 %v3058_v42, %v3058_v42  ;;  %v3059_v50 = vmax.f32 %v3827_v10, 0.0 }
 0x401   : > { %3221 = vst.msk [vmem:[%s5293_s21 + $0x28] sm:$0xf] %vm3210_vm0, %v3476_v57  ;;  %v3477_v48 = vpack.c.bf16 %v3061_v25, %v3061_v25 }
 0x402   : > { %3219 = vst.msk [vmem:[%s5293_s21 + $0x20] sm:$0xf] %vm3210_vm0, %v3474_v40  ;;  %v3475_v0 = vpack.c.bf16 %v3059_v50, %v3059_v50  ;;  %v3786_v7 = vpop.f32.mrb[44].mxu0 }
 0x403   : > { %3222 = vst.msk [vmem:[%s5293_s21 + $0x2c] sm:$0xf] %vm3210_vm0, %v3477_v48  ;;  %v3829_v4 = vadd.f32 %v5284_v47, %v3786_v7  ;;  %v2939_v20 = vpop.f32.mrb[45].mxu0 }
 0x404   : > { %3220 = vst.msk [vmem:[%s5293_s21 + $0x24] sm:$0xf] %vm3210_vm0, %v3475_v0  ;;  %v3831_v60 = vadd.f32 %v5284_v47, %v2939_v20  ;;  %v3787_v30 = vpop.f32.mrb[46].mxu0 }
 0x405   : > { %v3064_v1 = vmax.f32 %v3829_v4, 0.0  ;;  %v3833_v18 = vadd.f32 %v5284_v47, %v3787_v30  ;;  %v2942_v28 = vpop.f32.mrb[47].mxu0 }
 0x406   : > { %v3062_v41 = vmax.f32 %v3831_v60, 0.0  ;;  %v3835_v33 = vadd.f32 %v5284_v47, %v2942_v28 }
 0x407   : > { %v3480_v37 = vpack.c.bf16 %v3064_v1, %v3064_v1  ;;  %v3065_v52 = vmax.f32 %v3833_v18, 0.0 }
 0x408   : > { %v3478_v8 = vpack.c.bf16 %v3062_v41, %v3062_v41  ;;  %v3063_v11 = vmax.f32 %v3835_v33, 0.0 }
 0x409   : > { %3225 = vst.msk [vmem:[%s5293_s21 + $0x38] sm:$0xf] %vm3210_vm0, %v3480_v37  ;;  %v3481_v34 = vpack.c.bf16 %v3065_v52, %v3065_v52 }
 0x40a   : > { %3223 = vst.msk [vmem:[%s5293_s21 + $0x30] sm:$0xf] %vm3210_vm0, %v3478_v8  ;;  %v3479_v15 = vpack.c.bf16 %v3063_v11, %v3063_v11  ;;  %v3790_v17 = vpop.f32.mrb[48].mxu0 }
 0x40b   : > { %3226 = vst.msk [vmem:[%s5293_s21 + $0x3c] sm:$0xf] %vm3210_vm0, %v3481_v34  ;;  %v3837_v58 = vadd.f32 %v5284_v47, %v3790_v17  ;;  %v2955_v21 = vpop.f32.mrb[49].mxu0 }
 0x40c   : > { %3224 = vst.msk [vmem:[%s5293_s21 + $0x34] sm:$0xf] %vm3210_vm0, %v3479_v15  ;;  %v3839_v32 = vadd.f32 %v5284_v47, %v2955_v21  ;;  %v3791_v62 = vpop.f32.mrb[50].mxu0 }
 0x40d   : > { %v3068_v23 = vmax.f32 %v3837_v58, 0.0  ;;  %v3841_v22 = vadd.f32 %v5284_v47, %v3791_v62  ;;  %v2958_v39 = vpop.f32.mrb[51].mxu0 }
 0x40e   : > { %v3066_v13 = vmax.f32 %v3839_v32, 0.0  ;;  %v3843_v2 = vadd.f32 %v5284_v47, %v2958_v39 }
 0x40f   : > { %v3484_v6 = vpack.c.bf16 %v3068_v23, %v3068_v23  ;;  %v3069_v61 = vmax.f32 %v3841_v22, 0.0 }
 0x410   : > { %v3482_v35 = vpack.c.bf16 %v3066_v13, %v3066_v13  ;;  %v3067_v3 = vmax.f32 %v3843_v2, 0.0 }
 0x411   : > { %3229 = vst.msk [vmem:[%s5293_s21 + $0x48] sm:$0xf] %vm3210_vm0, %v3484_v6  ;;  %v3485_v45 = vpack.c.bf16 %v3069_v61, %v3069_v61 }
 0x412   : > { %3227 = vst.msk [vmem:[%s5293_s21 + $0x40] sm:$0xf] %vm3210_vm0, %v3482_v35  ;;  %v3483_v44 = vpack.c.bf16 %v3067_v3, %v3067_v3  ;;  %v3794_v19 = vpop.f32.mrb[52].mxu0 }
 0x413   : > { %3230 = vst.msk [vmem:[%s5293_s21 + $0x4c] sm:$0xf] %vm3210_vm0, %v3485_v45  ;;  %v3845_v5 = vadd.f32 %v5284_v47, %v3794_v19  ;;  %v2971_v49 = vpop.f32.mrb[53].mxu0 }
 0x414   : > { %3228 = vst.msk [vmem:[%s5293_s21 + $0x44] sm:$0xf] %vm3210_vm0, %v3483_v44  ;;  %v3847_v56 = vadd.f32 %v5284_v47, %v2971_v49  ;;  %v3795_v59 = vpop.f32.mrb[54].mxu0 }
 0x415   : > { %v3072_v9 = vmax.f32 %v3845_v5, 0.0  ;;  %v3849_v38 = vadd.f32 %v5284_v47, %v3795_v59  ;;  %v2974_v12 = vpop.f32.mrb[55].mxu0 }
 0x416   : > { %v3070_v63 = vmax.f32 %v3847_v56, 0.0  ;;  %v3851_v26 = vadd.f32 %v5284_v47, %v2974_v12 }
 0x417   : > { %v3488_v43 = vpack.c.bf16 %v3072_v9, %v3072_v9  ;;  %v3073_v54 = vmax.f32 %v3849_v38, 0.0 }
 0x418   : > { %v3486_v53 = vpack.c.bf16 %v3070_v63, %v3070_v63  ;;  %v3071_v27 = vmax.f32 %v3851_v26, 0.0 }
 0x419   : > { %3233 = vst.msk [vmem:[%s5293_s21 + $0x58] sm:$0xf] %vm3210_vm0, %v3488_v43  ;;  %v3489_v51 = vpack.c.bf16 %v3073_v54, %v3073_v54 }
 0x41a   : > { %3231 = vst.msk [vmem:[%s5293_s21 + $0x50] sm:$0xf] %vm3210_vm0, %v3486_v53  ;;  %v3487_v46 = vpack.c.bf16 %v3071_v27, %v3071_v27  ;;  %v3798_v31 = vpop.f32.mrb[56].mxu0 }
 0x41b   : > { %3234 = vst.msk [vmem:[%s5293_s21 + $0x5c] sm:$0xf] %vm3210_vm0, %v3489_v51  ;;  %v3853_v24 = vadd.f32 %v5284_v47, %v3798_v31  ;;  %v2987_v55 = vpop.f32.mrb[57].mxu0 }
 0x41c   : > { %3232 = vst.msk [vmem:[%s5293_s21 + $0x54] sm:$0xf] %vm3210_vm0, %v3487_v46  ;;  %v3855_v14 = vadd.f32 %v5284_v47, %v2987_v55  ;;  %v3799_v36 = vpop.f32.mrb[58].mxu0 }
 0x41d   : > { %v3076_v16 = vmax.f32 %v3853_v24, 0.0  ;;  %v3857_v29 = vadd.f32 %v5284_v47, %v3799_v36  ;;  %v2990_v42 = vpop.f32.mrb[59].mxu0 }
 0x41e   : > { %v3074_v10 = vmax.f32 %v3855_v14, 0.0  ;;  %v3859_v57 = vadd.f32 %v5284_v47, %v2990_v42 }
 0x41f   : > { %v3492_v25 = vpack.c.bf16 %v3076_v16, %v3076_v16  ;;  %v3077_v40 = vmax.f32 %v3857_v29, 0.0 }
 0x420   : > { %v3490_v50 = vpack.c.bf16 %v3074_v10, %v3074_v10  ;;  %v3075_v48 = vmax.f32 %v3859_v57, 0.0 }
 0x421   : > { %3237 = vst.msk [vmem:[%s5293_s21 + $0x68] sm:$0xf] %vm3210_vm0, %v3492_v25  ;;  %v3493_v0 = vpack.c.bf16 %v3077_v40, %v3077_v40 }
 0x422   : > { %3235 = vst.msk [vmem:[%s5293_s21 + $0x60] sm:$0xf] %vm3210_vm0, %v3490_v50  ;;  %v3491_v7 = vpack.c.bf16 %v3075_v48, %v3075_v48  ;;  %v3802_v4 = vpop.f32.mrb[60].mxu0 }
 0x423   : > { %3238 = vst.msk [vmem:[%s5293_s21 + $0x6c] sm:$0xf] %vm3210_vm0, %v3493_v0  ;;  %v3861_v20 = vadd.f32 %v5284_v47, %v3802_v4  ;;  %v3003_v60 = vpop.f32.mrb[61].mxu0 }
 0x424   : > { %3236 = vst.msk [vmem:[%s5293_s21 + $0x64] sm:$0xf] %vm3210_vm0, %v3491_v7  ;;  %v3863_v30 = vadd.f32 %v5284_v47, %v3003_v60  ;;  %v3803_v1 = vpop.f32.mrb[62].mxu0 }
 0x425   : > { %v3080_v18 = vmax.f32 %v3861_v20, 0.0  ;;  %v3865_v28 = vadd.f32 %v5284_v47, %v3803_v1  ;;  %v3006_v41 = vpop.f32.mrb[63].mxu0 }
 0x426   : > { %v3078_v33 = vmax.f32 %v3863_v30, 0.0  ;;  %v3867_v37 = vadd.f32 %v5284_v47, %v3006_v41 }
 0x427   : > { %v3496_v52 = vpack.c.bf16 %v3080_v18, %v3080_v18  ;;  %v3081_v8 = vmax.f32 %v3865_v28, 0.0 }
 0x428   : > { %v3494_v11 = vpack.c.bf16 %v3078_v33, %v3078_v33  ;;  %v3079_v34 = vmax.f32 %v3867_v37, 0.0 }
 0x429   : > { %3241 = vst.msk [vmem:[%s5293_s21 + $0x78] sm:$0xf] %vm3210_vm0, %v3496_v52  ;;  %v3497_v15 = vpack.c.bf16 %v3081_v8, %v3081_v8 }
 0x42a   : > { %3239 = vst.msk [vmem:[%s5293_s21 + $0x70] sm:$0xf] %vm3210_vm0, %v3494_v11  ;;  %v3495_v17 = vpack.c.bf16 %v3079_v34, %v3079_v34 }
 0x42b   : > { %3242 = vst.msk [vmem:[%s5293_s21 + $0x7c] sm:$0xf] %vm3210_vm0, %v3497_v15 }
 0x42c   : > { %3240 = vst.msk [vmem:[%s5293_s21 + $0x74] sm:$0xf] %vm3210_vm0, %v3495_v17 }
 0x42d PF: > { %s19_s30 = sadd.s32 1, %s4182_s30  }
 0x42e   : > { %p16_p4 = scmp.ge.s32.totalorder %s19_s30, 4  }
 0x430   :  { %18 = sbr.rel (!%p16_p4) target bundleno = 1 (0x1), region = 88 }

</bundles_post_ra>
